<compile_context>
chip_gen: v7x
topology: tpu7x:2x2x1
jax: 0.10.0
libtpu: 0.0.40
codegen_flags: <defaults>
</compile_context>

<pallas_src>
import jax
import jax.numpy as jnp
from jax.experimental import pallas as pl
from jax.experimental.pallas import tpu as pltpu

# ----------------------------- model constants -----------------------------
LATENT_DIM = 20
L_IN = 480          # conv1(k=6,s=6) -> 80 ; conv2(k=4,s=4) -> 20 ; 20*20 = 400
K1, C1 = 6, 40      # conv1 kernel/stride, out channels
K2, C2 = 4, 20      # conv2 kernel/stride, out channels
N_POS = 20          # conv2 output length
H_FC = 50           # fc1 width

# ----------------------------- kernel layout --------------------------------
G = 4                       # conv2 positions processed per group
NG = N_POS // G             # 5 groups
Q_PER_G = G * K2            # 16 conv1 positions per group
SPG = Q_PER_G * K1          # 96 input samples per group
W1_COLS = Q_PER_G * C1      # 640
FPG = G * C2                # 80 fc1 contraction rows per group

# bias slab (1, 1024): every segment starts on a 128-lane boundary
B1_OFF, B1_LEN = 0, W1_COLS          # 0..640    conv1 bias (tiled)
B2_OFF, B2_LEN = 640, FPG            # 640..720  conv2 bias (tiled)
BF_OFF, BF_LEN = 768, H_FC           # 768..818  fc1 bias
BH_OFF, BH_LEN = 896, 128            # 896..1024 mu|var bias (lane padded)
BIAS_W = 1024
HEAD_W = 128                         # padded head output width (40 used)


def _tree_sum(xs):
    """Balanced add tree (breaks the serial accumulation dependency)."""
    while len(xs) > 1:
        nxt = [xs[i] + xs[i + 1] for i in range(0, len(xs) - 1, 2)]
        if len(xs) % 2:
            nxt.append(xs[-1])
        xs = nxt
    return xs[0]


# ---------------------------------------------------------------------------
# Fused Pallas kernel
# ---------------------------------------------------------------------------
def _encoder_kernel(x_ref, w1_ref, w2_ref, wf_ref, wh_ref, b_ref, out_ref):
    b1 = b_ref[:, B1_OFF:B1_OFF + B1_LEN]        # (1, 640)
    b2 = b_ref[:, B2_OFF:B2_OFF + B2_LEN]        # (1, 80)
    bf = b_ref[:, BF_OFF:BF_OFF + BF_LEN]        # (1, 50)
    bh = b_ref[:, BH_OFF:BH_OFF + BH_LEN]        # (1, 128)

    parts = []
    for g in range(NG):
        # receptive field of 4 conv2 positions: static lane slice of the input
        xg = x_ref[:, g * SPG:(g + 1) * SPG]                       # (B, 96)
        # conv1 for 16 conv1 positions at once (block-diagonal wide weight)
        h1 = jnp.maximum(
            jnp.dot(xg, w1_ref[...], preferred_element_type=jnp.float32) + b1,
            0.0)                                                    # (B, 640)
        # conv2 for the 4 positions of this group (block-diagonal wide weight)
        h2 = jnp.maximum(
            jnp.dot(h1, w2_ref[...], preferred_element_type=jnp.float32) + b2,
            0.0)                                                    # (B, 80)
        # fc1 partial contraction, K = 80 (weight rows pre-permuted to match
        # torch.flatten's o*20+t ordering)
        parts.append(jnp.dot(h2, wf_ref[g * FPG:(g + 1) * FPG, :],
                             preferred_element_type=jnp.float32))   # (B, 50)

    h = jnp.maximum(_tree_sum(parts) + bf, 0.0)                     # (B, 50)

    # fused mu|var head -> one lane-dense (B, 128) store
    out_ref[...] = (jnp.dot(h, wh_ref[...], preferred_element_type=jnp.float32)
                    + bh)


# ---------------------------------------------------------------------------
# One-time parameter packing (hoisted out of the per-call path)
# ---------------------------------------------------------------------------
def pack_params(p):
    # conv1: block-diagonal (96, 640); block q: rows 6q..6q+5, cols 40q..40q+39
    blk1 = p["conv1_w"].reshape(C1, K1).T                    # (6, 40), [m, c]
    w1g = jnp.zeros((SPG, W1_COLS), jnp.float32)
    for q in range(Q_PER_G):
        w1g = w1g.at[q * K1:(q + 1) * K1, q * C1:(q + 1) * C1].set(blk1)

    # conv2: block-diagonal (640, 80); block p: rows 160p.., cols 20p..
    blk2 = p["conv2_w"].transpose(2, 1, 0).reshape(K2 * C1, C2)   # row kk*40+c
    w2g = jnp.zeros((W1_COLS, FPG), jnp.float32)
    for pp in range(G):
        w2g = w2g.at[pp * K2 * C1:(pp + 1) * K2 * C1,
                     pp * C2:(pp + 1) * C2].set(blk2)

    # fc1: row g*80 + p*20 + o  <->  fc1_w column o*20 + (g*4 + p)
    wf = (p["fc1_w"].reshape(H_FC, C2, NG, G)
          .transpose(2, 3, 1, 0).reshape(NG * FPG, H_FC))          # (400, 50)

    # fused mu|var head, lane-padded to 128 output columns
    wh = jnp.zeros((H_FC, HEAD_W), jnp.float32)
    wh = wh.at[:, :LATENT_DIM].set(p["mu_w"].T)
    wh = wh.at[:, LATENT_DIM:2 * LATENT_DIM].set(p["var_w"].T)

    # single bias slab, every segment 128-lane aligned
    bias = jnp.zeros((1, BIAS_W), jnp.float32)
    bias = bias.at[0, B1_OFF:B1_OFF + B1_LEN].set(jnp.tile(p["conv1_b"], Q_PER_G))
    bias = bias.at[0, B2_OFF:B2_OFF + B2_LEN].set(jnp.tile(p["conv2_b"], G))
    bias = bias.at[0, BF_OFF:BF_OFF + BF_LEN].set(p["fc1_b"])
    bias = bias.at[0, BH_OFF:BH_OFF + LATENT_DIM].set(p["mu_b"])
    bias = bias.at[0, BH_OFF + LATENT_DIM:BH_OFF + 2 * LATENT_DIM].set(p["var_b"])

    return (w1g, w2g, wf, wh, bias)


# ---------------------------------------------------------------------------
# Forward wrapper (only a free reshape + the single pallas_call per step)
# ---------------------------------------------------------------------------
def encoder_forward(x, packed):
    """x: (B, 1, 480) float32, packed = pack_params(p) -> (z_mu, z_var)."""
    w1g, w2g, wf, wh, bias = packed
    B = x.shape[0]
    x2 = x.reshape(B, L_IN)                       # layout-preserving, free

    vmem = pl.BlockSpec(memory_space=pltpu.MemorySpace.VMEM)
    out = pl.pallas_call(
        _encoder_kernel,
        out_shape=jax.ShapeDtypeStruct((B, HEAD_W), jnp.float32),
        in_specs=[vmem] * 6,
        out_specs=vmem,
    )(x2, w1g, w2g, wf, wh, bias)
    return out[:, :LATENT_DIM], out[:, LATENT_DIM:2 * LATENT_DIM]


# ---------------------------------------------------------------------------
# Pure-JAX reference (for correctness check)
# ---------------------------------------------------------------------------
def encoder_reference(x, p):
    def conv1d(x, w, b, stride):
        y = jax.lax.conv_general_dilated(
            x, w, (stride,), "VALID", dimension_numbers=("NCH", "OIH", "NCH"))
        return y + b[None, :, None]

    h = jax.nn.relu(conv1d(x, p["conv1_w"], p["conv1_b"], K1))
    h = jax.nn.relu(conv1d(h, p["conv2_w"], p["conv2_b"], K2))
    h = h.reshape(h.shape[0], -1)
    h = jax.nn.relu(h @ p["fc1_w"].T + p["fc1_b"])
    return h @ p["mu_w"].T + p["mu_b"], h @ p["var_w"].T + p["var_b"]


# ---------------------------------------------------------------------------
def init_params(key):
    ks = jax.random.split(key, 10)
    s = 0.1
    return {
        "conv1_w": s * jax.random.normal(ks[0], (C1, 1, K1), jnp.float32),
        "conv1_b": s * jax.random.normal(ks[1], (C1,), jnp.float32),
        "conv2_w": s * jax.random.normal(ks[2], (C2, C1, K2), jnp.float32),
        "conv2_b": s * jax.random.normal(ks[3], (C2,), jnp.float32),
        "fc1_w":   s * jax.random.normal(ks[4], (H_FC, C2 * N_POS), jnp.float32),
        "fc1_b":   s * jax.random.normal(ks[5], (H_FC,), jnp.float32),
        "mu_w":    s * jax.random.normal(ks[6], (LATENT_DIM, H_FC), jnp.float32),
        "mu_b":    s * jax.random.normal(ks[7], (LATENT_DIM,), jnp.float32),
        "var_w":   s * jax.random.normal(ks[8], (LATENT_DIM, H_FC), jnp.float32),
        "var_b":   s * jax.random.normal(ks[9], (LATENT_DIM,), jnp.float32),
    }


if __name__ == "__main__":
    key = jax.random.PRNGKey(0)
    k_x, k_p = jax.random.split(key)
    B = 2
    x = jax.random.normal(k_x, (B, 1, L_IN), jnp.float32)
    params = init_params(k_p)

    # pack weights ONCE; the per-call path is just one pallas_call
    packed = jax.tree_util.tree_map(jax.block_until_ready, pack_params(params))

    fwd = jax.jit(encoder_forward)
    z_mu, z_var = fwd(x, packed)
    jax.block_until_ready((z_mu, z_var))

    r_mu, r_var = encoder_reference(x, params)
    assert z_mu.shape == (B, LATENT_DIM) and z_var.shape == (B, LATENT_DIM)
    assert jnp.allclose(z_mu, r_mu, atol=1e-4, rtol=1e-4)
    assert jnp.allclose(z_var, r_var, atol=1e-4, rtol=1e-4)

    print("KERNEL_OK")
</pallas_src>

<mosaic_0001>
module attributes {stable_mosaic.version = 11 : i64} {
  func.func @_encoder_kernel(%arg0: memref<2x480xf32, #tpu.memory_space<vmem>>, %arg1: memref<96x640xf32, #tpu.memory_space<vmem>>, %arg2: memref<640x80xf32, #tpu.memory_space<vmem>>, %arg3: memref<400x50xf32, #tpu.memory_space<vmem>>, %arg4: memref<50x128xf32, #tpu.memory_space<vmem>>, %arg5: memref<1x1024xf32, #tpu.memory_space<vmem>>, %arg6: memref<2x128xf32, #tpu.memory_space<vmem>>) attributes {dimension_semantics = [], scalar_prefetch = 0 : i64, scratch_operands = 0 : i64, tpu.core_type = #tpu.core_type<tc>} {
    %c0 = arith.constant 0 : index
    %c0_0 = arith.constant 0 : index
    %0 = vector.load %arg5[%c0, %c0_0] : memref<1x1024xf32, #tpu.memory_space<vmem>>, vector<1x640xf32>
    %c0_1 = arith.constant 0 : index
    %c640 = arith.constant 640 : index
    %1 = vector.load %arg5[%c0_1, %c640] : memref<1x1024xf32, #tpu.memory_space<vmem>>, vector<1x80xf32>
    %c0_2 = arith.constant 0 : index
    %c768 = arith.constant 768 : index
    %2 = vector.load %arg5[%c0_2, %c768] : memref<1x1024xf32, #tpu.memory_space<vmem>>, vector<1x50xf32>
    %c0_3 = arith.constant 0 : index
    %c896 = arith.constant 896 : index
    %3 = vector.load %arg5[%c0_3, %c896] : memref<1x1024xf32, #tpu.memory_space<vmem>>, vector<1x128xf32>
    %c0_4 = arith.constant 0 : index
    %c0_5 = arith.constant 0 : index
    %4 = vector.load %arg0[%c0_4, %c0_5] : memref<2x480xf32, #tpu.memory_space<vmem>>, vector<2x96xf32>
    %c0_6 = arith.constant 0 : index
    %c0_7 = arith.constant 0 : index
    %5 = vector.load %arg1[%c0_6, %c0_7] : memref<96x640xf32, #tpu.memory_space<vmem>>, vector<96x640xf32>
    %cst = arith.constant dense<0.000000e+00> : vector<2x640xf32>
    %6 = tpu.matmul %4, %5, %cst {dimension_numbers = #tpu.dot_dimension_numbers<[1], [0], [0], [1], [0, 0, 1, 1], [], []>} : vector<2x96xf32>, vector<96x640xf32>, vector<2x640xf32> -> vector<2x640xf32>
    %7 = vector.broadcast %0 : vector<1x640xf32> to vector<2x640xf32>
    %8 = arith.addf %6, %7 : vector<2x640xf32>
    %cst_8 = arith.constant 0.000000e+00 : f32
    %9 = vector.broadcast %cst_8 : f32 to vector<2x640xf32>
    %10 = arith.maximumf %8, %9 : vector<2x640xf32>
    %c0_9 = arith.constant 0 : index
    %c0_10 = arith.constant 0 : index
    %11 = vector.load %arg2[%c0_9, %c0_10] : memref<640x80xf32, #tpu.memory_space<vmem>>, vector<640x80xf32>
    %cst_11 = arith.constant dense<0.000000e+00> : vector<2x80xf32>
    %12 = tpu.matmul %10, %11, %cst_11 {dimension_numbers = #tpu.dot_dimension_numbers<[1], [0], [0], [1], [0, 0, 1, 1], [], []>} : vector<2x640xf32>, vector<640x80xf32>, vector<2x80xf32> -> vector<2x80xf32>
    %13 = vector.broadcast %1 : vector<1x80xf32> to vector<2x80xf32>
    %14 = arith.addf %12, %13 : vector<2x80xf32>
    %cst_12 = arith.constant 0.000000e+00 : f32
    %15 = vector.broadcast %cst_12 : f32 to vector<2x80xf32>
    %16 = arith.maximumf %14, %15 : vector<2x80xf32>
    %c0_13 = arith.constant 0 : index
    %c0_14 = arith.constant 0 : index
    %17 = vector.load %arg3[%c0_13, %c0_14] : memref<400x50xf32, #tpu.memory_space<vmem>>, vector<80x50xf32>
    %cst_15 = arith.constant dense<0.000000e+00> : vector<2x50xf32>
    %18 = tpu.matmul %16, %17, %cst_15 {dimension_numbers = #tpu.dot_dimension_numbers<[1], [0], [0], [1], [0, 0, 1, 1], [], []>} : vector<2x80xf32>, vector<80x50xf32>, vector<2x50xf32> -> vector<2x50xf32>
    %c0_16 = arith.constant 0 : index
    %c96 = arith.constant 96 : index
    %19 = vector.load %arg0[%c0_16, %c96] : memref<2x480xf32, #tpu.memory_space<vmem>>, vector<2x96xf32>
    %c0_17 = arith.constant 0 : index
    %c0_18 = arith.constant 0 : index
    %20 = vector.load %arg1[%c0_17, %c0_18] : memref<96x640xf32, #tpu.memory_space<vmem>>, vector<96x640xf32>
    %cst_19 = arith.constant dense<0.000000e+00> : vector<2x640xf32>
    %21 = tpu.matmul %19, %20, %cst_19 {dimension_numbers = #tpu.dot_dimension_numbers<[1], [0], [0], [1], [0, 0, 1, 1], [], []>} : vector<2x96xf32>, vector<96x640xf32>, vector<2x640xf32> -> vector<2x640xf32>
    %22 = vector.broadcast %0 : vector<1x640xf32> to vector<2x640xf32>
    %23 = arith.addf %21, %22 : vector<2x640xf32>
    %cst_20 = arith.constant 0.000000e+00 : f32
    %24 = vector.broadcast %cst_20 : f32 to vector<2x640xf32>
    %25 = arith.maximumf %23, %24 : vector<2x640xf32>
    %c0_21 = arith.constant 0 : index
    %c0_22 = arith.constant 0 : index
    %26 = vector.load %arg2[%c0_21, %c0_22] : memref<640x80xf32, #tpu.memory_space<vmem>>, vector<640x80xf32>
    %cst_23 = arith.constant dense<0.000000e+00> : vector<2x80xf32>
    %27 = tpu.matmul %25, %26, %cst_23 {dimension_numbers = #tpu.dot_dimension_numbers<[1], [0], [0], [1], [0, 0, 1, 1], [], []>} : vector<2x640xf32>, vector<640x80xf32>, vector<2x80xf32> -> vector<2x80xf32>
    %28 = vector.broadcast %1 : vector<1x80xf32> to vector<2x80xf32>
    %29 = arith.addf %27, %28 : vector<2x80xf32>
    %cst_24 = arith.constant 0.000000e+00 : f32
    %30 = vector.broadcast %cst_24 : f32 to vector<2x80xf32>
    %31 = arith.maximumf %29, %30 : vector<2x80xf32>
    %c80 = arith.constant 80 : index
    %c0_25 = arith.constant 0 : index
    %32 = vector.load %arg3[%c80, %c0_25] : memref<400x50xf32, #tpu.memory_space<vmem>>, vector<80x50xf32>
    %cst_26 = arith.constant dense<0.000000e+00> : vector<2x50xf32>
    %33 = tpu.matmul %31, %32, %cst_26 {dimension_numbers = #tpu.dot_dimension_numbers<[1], [0], [0], [1], [0, 0, 1, 1], [], []>} : vector<2x80xf32>, vector<80x50xf32>, vector<2x50xf32> -> vector<2x50xf32>
    %c0_27 = arith.constant 0 : index
    %c192 = arith.constant 192 : index
    %34 = vector.load %arg0[%c0_27, %c192] : memref<2x480xf32, #tpu.memory_space<vmem>>, vector<2x96xf32>
    %c0_28 = arith.constant 0 : index
    %c0_29 = arith.constant 0 : index
    %35 = vector.load %arg1[%c0_28, %c0_29] : memref<96x640xf32, #tpu.memory_space<vmem>>, vector<96x640xf32>
    %cst_30 = arith.constant dense<0.000000e+00> : vector<2x640xf32>
    %36 = tpu.matmul %34, %35, %cst_30 {dimension_numbers = #tpu.dot_dimension_numbers<[1], [0], [0], [1], [0, 0, 1, 1], [], []>} : vector<2x96xf32>, vector<96x640xf32>, vector<2x640xf32> -> vector<2x640xf32>
    %37 = vector.broadcast %0 : vector<1x640xf32> to vector<2x640xf32>
    %38 = arith.addf %36, %37 : vector<2x640xf32>
    %cst_31 = arith.constant 0.000000e+00 : f32
    %39 = vector.broadcast %cst_31 : f32 to vector<2x640xf32>
    %40 = arith.maximumf %38, %39 : vector<2x640xf32>
    %c0_32 = arith.constant 0 : index
    %c0_33 = arith.constant 0 : index
    %41 = vector.load %arg2[%c0_32, %c0_33] : memref<640x80xf32, #tpu.memory_space<vmem>>, vector<640x80xf32>
    %cst_34 = arith.constant dense<0.000000e+00> : vector<2x80xf32>
    %42 = tpu.matmul %40, %41, %cst_34 {dimension_numbers = #tpu.dot_dimension_numbers<[1], [0], [0], [1], [0, 0, 1, 1], [], []>} : vector<2x640xf32>, vector<640x80xf32>, vector<2x80xf32> -> vector<2x80xf32>
    %43 = vector.broadcast %1 : vector<1x80xf32> to vector<2x80xf32>
    %44 = arith.addf %42, %43 : vector<2x80xf32>
    %cst_35 = arith.constant 0.000000e+00 : f32
    %45 = vector.broadcast %cst_35 : f32 to vector<2x80xf32>
    %46 = arith.maximumf %44, %45 : vector<2x80xf32>
    %c160 = arith.constant 160 : index
    %c0_36 = arith.constant 0 : index
    %47 = vector.load %arg3[%c160, %c0_36] : memref<400x50xf32, #tpu.memory_space<vmem>>, vector<80x50xf32>
    %cst_37 = arith.constant dense<0.000000e+00> : vector<2x50xf32>
    %48 = tpu.matmul %46, %47, %cst_37 {dimension_numbers = #tpu.dot_dimension_numbers<[1], [0], [0], [1], [0, 0, 1, 1], [], []>} : vector<2x80xf32>, vector<80x50xf32>, vector<2x50xf32> -> vector<2x50xf32>
    %c0_38 = arith.constant 0 : index
    %c288 = arith.constant 288 : index
    %49 = vector.load %arg0[%c0_38, %c288] : memref<2x480xf32, #tpu.memory_space<vmem>>, vector<2x96xf32>
    %c0_39 = arith.constant 0 : index
    %c0_40 = arith.constant 0 : index
    %50 = vector.load %arg1[%c0_39, %c0_40] : memref<96x640xf32, #tpu.memory_space<vmem>>, vector<96x640xf32>
    %cst_41 = arith.constant dense<0.000000e+00> : vector<2x640xf32>
    %51 = tpu.matmul %49, %50, %cst_41 {dimension_numbers = #tpu.dot_dimension_numbers<[1], [0], [0], [1], [0, 0, 1, 1], [], []>} : vector<2x96xf32>, vector<96x640xf32>, vector<2x640xf32> -> vector<2x640xf32>
    %52 = vector.broadcast %0 : vector<1x640xf32> to vector<2x640xf32>
    %53 = arith.addf %51, %52 : vector<2x640xf32>
    %cst_42 = arith.constant 0.000000e+00 : f32
    %54 = vector.broadcast %cst_42 : f32 to vector<2x640xf32>
    %55 = arith.maximumf %53, %54 : vector<2x640xf32>
    %c0_43 = arith.constant 0 : index
    %c0_44 = arith.constant 0 : index
    %56 = vector.load %arg2[%c0_43, %c0_44] : memref<640x80xf32, #tpu.memory_space<vmem>>, vector<640x80xf32>
    %cst_45 = arith.constant dense<0.000000e+00> : vector<2x80xf32>
    %57 = tpu.matmul %55, %56, %cst_45 {dimension_numbers = #tpu.dot_dimension_numbers<[1], [0], [0], [1], [0, 0, 1, 1], [], []>} : vector<2x640xf32>, vector<640x80xf32>, vector<2x80xf32> -> vector<2x80xf32>
    %58 = vector.broadcast %1 : vector<1x80xf32> to vector<2x80xf32>
    %59 = arith.addf %57, %58 : vector<2x80xf32>
    %cst_46 = arith.constant 0.000000e+00 : f32
    %60 = vector.broadcast %cst_46 : f32 to vector<2x80xf32>
    %61 = arith.maximumf %59, %60 : vector<2x80xf32>
    %c240 = arith.constant 240 : index
    %c0_47 = arith.constant 0 : index
    %62 = vector.load %arg3[%c240, %c0_47] : memref<400x50xf32, #tpu.memory_space<vmem>>, vector<80x50xf32>
    %cst_48 = arith.constant dense<0.000000e+00> : vector<2x50xf32>
    %63 = tpu.matmul %61, %62, %cst_48 {dimension_numbers = #tpu.dot_dimension_numbers<[1], [0], [0], [1], [0, 0, 1, 1], [], []>} : vector<2x80xf32>, vector<80x50xf32>, vector<2x50xf32> -> vector<2x50xf32>
    %c0_49 = arith.constant 0 : index
    %c384 = arith.constant 384 : index
    %64 = vector.load %arg0[%c0_49, %c384] : memref<2x480xf32, #tpu.memory_space<vmem>>, vector<2x96xf32>
    %c0_50 = arith.constant 0 : index
    %c0_51 = arith.constant 0 : index
    %65 = vector.load %arg1[%c0_50, %c0_51] : memref<96x640xf32, #tpu.memory_space<vmem>>, vector<96x640xf32>
    %cst_52 = arith.constant dense<0.000000e+00> : vector<2x640xf32>
    %66 = tpu.matmul %64, %65, %cst_52 {dimension_numbers = #tpu.dot_dimension_numbers<[1], [0], [0], [1], [0, 0, 1, 1], [], []>} : vector<2x96xf32>, vector<96x640xf32>, vector<2x640xf32> -> vector<2x640xf32>
    %67 = vector.broadcast %0 : vector<1x640xf32> to vector<2x640xf32>
    %68 = arith.addf %66, %67 : vector<2x640xf32>
    %cst_53 = arith.constant 0.000000e+00 : f32
    %69 = vector.broadcast %cst_53 : f32 to vector<2x640xf32>
    %70 = arith.maximumf %68, %69 : vector<2x640xf32>
    %c0_54 = arith.constant 0 : index
    %c0_55 = arith.constant 0 : index
    %71 = vector.load %arg2[%c0_54, %c0_55] : memref<640x80xf32, #tpu.memory_space<vmem>>, vector<640x80xf32>
    %cst_56 = arith.constant dense<0.000000e+00> : vector<2x80xf32>
    %72 = tpu.matmul %70, %71, %cst_56 {dimension_numbers = #tpu.dot_dimension_numbers<[1], [0], [0], [1], [0, 0, 1, 1], [], []>} : vector<2x640xf32>, vector<640x80xf32>, vector<2x80xf32> -> vector<2x80xf32>
    %73 = vector.broadcast %1 : vector<1x80xf32> to vector<2x80xf32>
    %74 = arith.addf %72, %73 : vector<2x80xf32>
    %cst_57 = arith.constant 0.000000e+00 : f32
    %75 = vector.broadcast %cst_57 : f32 to vector<2x80xf32>
    %76 = arith.maximumf %74, %75 : vector<2x80xf32>
    %c320 = arith.constant 320 : index
    %c0_58 = arith.constant 0 : index
    %77 = vector.load %arg3[%c320, %c0_58] : memref<400x50xf32, #tpu.memory_space<vmem>>, vector<80x50xf32>
    %cst_59 = arith.constant dense<0.000000e+00> : vector<2x50xf32>
    %78 = tpu.matmul %76, %77, %cst_59 {dimension_numbers = #tpu.dot_dimension_numbers<[1], [0], [0], [1], [0, 0, 1, 1], [], []>} : vector<2x80xf32>, vector<80x50xf32>, vector<2x50xf32> -> vector<2x50xf32>
    %79 = arith.addf %18, %33 : vector<2x50xf32>
    %80 = arith.addf %48, %63 : vector<2x50xf32>
    %81 = arith.addf %79, %80 : vector<2x50xf32>
    %82 = arith.addf %81, %78 : vector<2x50xf32>
    %83 = vector.broadcast %2 : vector<1x50xf32> to vector<2x50xf32>
    %84 = arith.addf %82, %83 : vector<2x50xf32>
    %cst_60 = arith.constant 0.000000e+00 : f32
    %85 = vector.broadcast %cst_60 : f32 to vector<2x50xf32>
    %86 = arith.maximumf %84, %85 : vector<2x50xf32>
    %c0_61 = arith.constant 0 : index
    %c0_62 = arith.constant 0 : index
    %87 = vector.load %arg4[%c0_61, %c0_62] : memref<50x128xf32, #tpu.memory_space<vmem>>, vector<50x128xf32>
    %cst_63 = arith.constant dense<0.000000e+00> : vector<2x128xf32>
    %88 = tpu.matmul %86, %87, %cst_63 {dimension_numbers = #tpu.dot_dimension_numbers<[1], [0], [0], [1], [0, 0, 1, 1], [], []>} : vector<2x50xf32>, vector<50x128xf32>, vector<2x128xf32> -> vector<2x128xf32>
    %89 = vector.broadcast %3 : vector<1x128xf32> to vector<2x128xf32>
    %90 = arith.addf %88, %89 : vector<2x128xf32>
    %c0_64 = arith.constant 0 : index
    %c0_65 = arith.constant 0 : index
    %91 = vector.load %arg6[%c0_64, %c0_65] : memref<2x128xf32, #tpu.memory_space<vmem>>, vector<2x128xf32>
    tpu.vector_store %arg6[%c0_64, %c0_65], %90 {strides = array<i32>} : memref<2x128xf32, #tpu.memory_space<vmem>>, vector<2x128xf32>,
    return
  }
}

</mosaic_0001>

<bundles_post_ra>
// kernel: encoder_forward.1
= control target key start
LH: loop header
LB: loop body
LE: loop exit
PB: predicated region body
PF: predicated region fallthrough
CT: control target
= control target key end

     0   :  { %v6221_v3 = vmov 0.0   ;;  %s4814_s7 = smov 32   ;;  %vm114_vm0 = vcmask 785408   ;;  %vm4816_vm1 = vmmov 0   ;;  %vm656_vm2 = vcmask 261120   ;;  %s4817_s16 = smov 64   ;;  %s6214_s1 = inlined_call_operand.vmem [shape: f32[96,640], index: 1, kind: input, shape index: {}]   ;;  %s6215_s2 = inlined_call_operand.vmem [shape: f32[640,80], index: 2, kind: input, shape index: {}]   ;;  %s6216_s0 = inlined_call_operand.vmem [shape: f32[2,480], index: 0, kind: input, shape index: {}]   ;;  %s6217_s5 = inlined_call_operand.vmem [shape: f32[1,1024], index: 5, kind: input, shape index: {}]   ;;  %s6218_s3 = inlined_call_operand.vmem [shape: f32[400,50], index: 3, kind: input, shape index: {}]   ;;  %s6219_s4 = inlined_call_operand.vmem [shape: f32[50,128], index: 4, kind: input, shape index: {}]   ;;  %s6220_s6 = inlined_call_operand.vmem [shape: f32[2,128], index: 6, kind: output, shape index: {}]  }
   0x1   :  { %v29_v0 = vld [vmem:[%s6214_s1 + $0x8] sm:$0xff]  ;;  %v34_v1 = vld [vmem:[%s6214_s1 + $0x30] sm:$0xff]  ;;  %v31_v2 = vld [vmem:[%s6214_s1 + $0x18] sm:$0xff]  ;;  %182 = vmatprep.mubr.f32.mxu0 %v6221_v3  ;;  %253 = vmatprep.mubr.f32.mxu1 %v6221_v3  ;;  %vm1186_vm3 = vcmask 523264   ;;  %s4818_s15 = smov 96   ;;  %vm1098_vm4 = vcmask 654336  }
   0x2   :  { %v4865_v4 = vpack.c.bf16 %v34_v1, %v29_v0  ;;  %v36_v5 = vld [vmem:[%s6214_s1 + $0x40] sm:$0xff]  ;;  %v33_v7 = vld [vmem:[%s6214_s1 + $0x28] sm:$0xff]  ;;  %v30_v10 = vld [vmem:[%s6214_s1 + $0x10] sm:$0xff]  ;;  %vm2840_vm5 = vcmask 1041408   ;;  %vm2836_vm6 = vcmask 408576  }
   0x3   :  { %v28_v6 = vld [vmem:[%s6214_s1] sm:$0xff]  ;;  %v4876_v8 = vpack.c.bf16 %v36_v5, %v31_v2  ;;  %v35_v11 = vld [vmem:[%s6214_s1 + $0x38] sm:$0xff]  ;;  %v41_v15 = vld [vmem:[%s6214_s1 + $0x68] sm:$0xff] }
   0x4   :  { %6360 = vst [vmem:[#allocation2_spill] sm:$0xff] %v4865_v4  ;;  %v4878_v9 = vpack.c.bf16 %v33_v7, %v28_v6  ;;  %v39_v12 = vld [vmem:[%s6214_s1 + $0x58] sm:$0xff]  ;;  %3953 = vmatprep.subr.bf16.mxu0 %v4865_v4  ;;  %v4890_v13 = vpack.c.bf16 %v35_v11, %v30_v10  ;;  %v44_v14 = vld [vmem:[%s6214_s1 + $0x80] sm:$0xff]  ;;  %v46_v16 = vld [vmem:[%s6214_s1 + $0x90] sm:$0xff] }
   0x5   :  { %6361 = vst [vmem:[#allocation3_spill] sm:$0xff] %v4876_v8  ;;  %3977 = vmatprep.subr.bf16.mxu1 %v4876_v8  ;;  %v4903_v17 = vpack.c.bf16 %v44_v14, %v39_v12  ;;  %v4905_v18 = vpack.c.bf16 %v46_v16, %v41_v15  ;;  %v38_v19 = vld [vmem:[%s6214_s1 + $0x50] sm:$0xff]  ;;  %v43_v20 = vld [vmem:[%s6214_s1 + $0x78] sm:$0xff]  ;;  %v40_v21 = vld [vmem:[%s6214_s1 + $0x60] sm:$0xff] }
   0x6   :  { %6362 = vst [vmem:[#allocation4_spill] sm:$0xff] %v4890_v13  ;;  %3955 = vmatpush1.bf16.msra.mxu0 %v4878_v9  ;;  %3979 = vmatpush1.bf16.msra.mxu1 %v4890_v13  ;;  %v4917_v22 = vpack.c.bf16 %v43_v20, %v38_v19  ;;  %v45_v23 = vld [vmem:[%s6214_s1 + $0x88] sm:$0xff]  ;;  %v54_v25 = vld [vmem:[%s6214_s1 + $0xd0] sm:$0xff]  ;;  %v51_v28 = vld [vmem:[%s6214_s1 + $0xb8] sm:$0xff] }
   0x7   :  { %6363 = vst [vmem:[#allocation5_spill] sm:$0xff] %v4905_v18  ;;  %v49_v24 = vld [vmem:[%s6214_s1 + $0xa8] sm:$0xff]  ;;  %3957 = vmatprep.subr.bf16.mxu0 %v4903_v17  ;;  %3981 = vmatprep.subr.bf16.mxu1 %v4905_v18  ;;  %v4930_v26 = vpack.c.bf16 %v45_v23, %v40_v21  ;;  %v56_v29 = vld [vmem:[%s6214_s1 + $0xe0] sm:$0xff]  ;;  %v50_v33 = vld [vmem:[%s6214_s1 + $0xb0] sm:$0xff] }
   0x8   :  { %v4932_v27 = vpack.c.bf16 %v54_v25, %v49_v24  ;;  %v48_v30 = vld [vmem:[%s6214_s1 + $0xa0] sm:$0xff]  ;;  %v4943_v31 = vpack.c.bf16 %v56_v29, %v51_v28  ;;  %v53_v32 = vld [vmem:[%s6214_s1 + $0xc8] sm:$0xff]  ;;  %v55_v34 = vld [vmem:[%s6214_s1 + $0xd8] sm:$0xff] }
   0x9   :  { %6364 = vst [vmem:[#allocation6_spill] sm:$0xff] %v4930_v26  ;;  %v4955_v35 = vpack.c.bf16 %v53_v32, %v48_v30  ;;  %v59_v36 = vld [vmem:[%s6214_s1 + $0xf8] sm:$0xff]  ;;  %v64_v37 = vld [vmem:[%s6214_s1 + $0x120] sm:$0xff]  ;;  %v61_v38 = vld [vmem:[%s6214_s1 + $0x108] sm:$0xff]  ;;  %v4968_v39 = vpack.c.bf16 %v55_v34, %v50_v33  ;;  %v6223_v33 = vmov 0.0|0.0  }
   0xa   :  { %6365 = vst [vmem:[#allocation7_spill] sm:$0xff] %v4943_v31  ;;  %3959 = vmatpush1.bf16.msra.mxu0 %v4917_v22  ;;  %3983 = vmatpush1.bf16.msra.mxu1 %v4930_v26  ;;  %v4970_v40 = vpack.c.bf16 %v64_v37, %v59_v36  ;;  %v66_v41 = vld [vmem:[%s6214_s1 + $0x130] sm:$0xff]  ;;  %v63_v43 = vld [vmem:[%s6214_s1 + $0x118] sm:$0xff]  ;;  %v60_v45 = vld [vmem:[%s6214_s1 + $0x100] sm:$0xff] }
   0xb   :  { %3961 = vmatprep.subr.bf16.mxu0 %v4932_v27  ;;  %6366 = vst [vmem:[#allocation8_spill] sm:$0xff] %v4968_v39  ;;  %v58_v42 = vld [vmem:[%s6214_s1 + $0xf0] sm:$0xff]  ;;  %3985 = vmatprep.subr.bf16.mxu1 %v4943_v31  ;;  %v4982_v44 = vpack.c.bf16 %v66_v41, %v61_v38  ;;  %v65_v46 = vld [vmem:[%s6214_s1 + $0x128] sm:$0xff]  ;;  %v71_v49 = vld [vmem:[%s6214_s1 + $0x158] sm:$0xff] }
   0xc   :  { %v69_v47 = vld [vmem:[%s6214_s1 + $0x148] sm:$0xff]  ;;  %v74_v48 = vld [vmem:[%s6214_s1 + $0x170] sm:$0xff]  ;;  %v76_v50 = vld [vmem:[%s6214_s1 + $0x180] sm:$0xff]  ;;  %v5003_v51 = vpack.c.bf16 %v63_v43, %v58_v42  ;;  %v5007_v52 = vpack.c.bf16 %v65_v46, %v60_v45 }
   0xd   :  { %6367 = vst [vmem:[#allocation9_spill] sm:$0xff] %v4982_v44  ;;  %v5009_v53 = vpack.c.bf16 %v74_v48, %v69_v47  ;;  %v68_v54 = vld [vmem:[%s6214_s1 + $0x140] sm:$0xff]  ;;  %v73_v55 = vld [vmem:[%s6214_s1 + $0x168] sm:$0xff]  ;;  %v70_v56 = vld [vmem:[%s6214_s1 + $0x150] sm:$0xff]  ;;  %v5021_v57 = vpack.c.bf16 %v76_v50, %v71_v49 }
   0xe   :  { %3963 = vmatpush1.bf16.msra.mxu0 %v4955_v35  ;;  %3987 = vmatpush1.bf16.msra.mxu1 %v4968_v39  ;;  %6368 = vst [vmem:[#allocation10_spill] sm:$0xff] %v5007_v52  ;;  %v75_v58 = vld [vmem:[%s6214_s1 + $0x178] sm:$0xff]  ;;  %v84_v60 = vld [vmem:[%s6214_s1 + $0x1c0] sm:$0xff]  ;;  %v81_v61 = vld [vmem:[%s6214_s1 + $0x1a8] sm:$0xff]  ;;  %v5039_v63 = vpack.c.bf16 %v73_v55, %v68_v54 }
   0xf   :  { %3965 = vmatprep.subr.bf16.mxu0 %v4970_v40  ;;  %3989 = vmatprep.subr.bf16.mxu1 %v4982_v44  ;;  %6369 = vst [vmem:[#allocation11_spill] sm:$0xff] %v5021_v57  ;;  %v79_v59 = vld [vmem:[%s6214_s1 + $0x198] sm:$0xff]  ;;  %v86_v62 = vld [vmem:[%s6214_s1 + $0x1d0] sm:$0xff]  ;;  %v5043_v0 = vpack.c.bf16 %v75_v58, %v70_v56  ;;  %v80_v7 = vld [vmem:[%s6214_s1 + $0x1a0] sm:$0xff] }
  0x10   :  { %v5045_v1 = vpack.c.bf16 %v84_v60, %v79_v59  ;;  %v78_v2 = vld [vmem:[%s6214_s1 + $0x190] sm:$0xff]  ;;  %v83_v5 = vld [vmem:[%s6214_s1 + $0x1b8] sm:$0xff]  ;;  %v5054_v6 = vpack.c.bf16 %v86_v62, %v81_v61  ;;  %v85_v10 = vld [vmem:[%s6214_s1 + $0x1c8] sm:$0xff] }
  0x11   :  { %6370 = vst [vmem:[#allocation12_spill] sm:$0xff] %v5043_v0  ;;  %v5063_v11 = vpack.c.bf16 %v83_v5, %v78_v2  ;;  %v2923_v12 = vld.sshfl [vmem:[%s6216_s0] sm:$0x33 pattern:$0x76325410]  ;;  %v5073_v15 = vpack.c.bf16 %v85_v10, %v80_v7  ;;  %v37_v19 = vld [vmem:[%s6214_s1 + $0x48] sm:$0xff] }
  0x12   :  { %3967 = vmatpush1.bf16.msra.mxu0 %v5003_v51  ;;  %3991 = vmatpush1.bf16.msra.mxu1 %v5007_v52  ;;  %6371 = vst [vmem:[#allocation13_spill] sm:$0xff] %v5045_v1  ;;  %6372 = vst [vmem:[#allocation14_spill] sm:$0xff] %v5054_v6  ;;  %v351_v14 = vld [vmem:[%s6215_s2 + $0x80] sm:$0xff]  ;;  %v352_v20 = vld [vmem:[%s6215_s2 + $0x88] sm:$0xff]  ;;  %v651_v21 = vcombine.high %v2923_v12, %v2923_v12 }
  0x13   :  { %3969 = vmatprep.subr.bf16.mxu0 %v5009_v53  ;;  %3993 = vmatprep.subr.bf16.mxu1 %v5021_v57  ;;  %6373 = vst [vmem:[#allocation15_spill] sm:$0xff] %v5073_v15  ;;  %v32_v16 = vld [vmem:[%s6214_s1 + $0x20] sm:$0xff]  ;;  %v5085_v23 = vpack.c.bf16 %v352_v20, %v351_v14  ;;  %v336_v25 = vld [vmem:[%s6215_s2 + $0x8] sm:$0xff]  ;;  %v353_v30 = vld [vmem:[%s6215_s2 + $0x90] sm:$0xff] }
  0x14   :  { %652 = vrot.lane.b32.xlu0 %v2923_v12, %s4814_s7  ;;  %v335_v24 = vld [vmem:[%s6215_s2] sm:$0xff]  ;;  %v5099_v29 = vpack.c.bf16 %v37_v19, %v32_v16  ;;  %v354_v32 = vld [vmem:[%s6215_s2 + $0x98] sm:$0xff]  ;;  %v42_v34 = vld [vmem:[%s6214_s1 + $0x70] sm:$0xff] }
  0x15   :  { %6374 = vst [vmem:[#allocation16_spill] sm:$0xff] %v5085_v23  ;;  %v5097_v28 = vld [vmem:[%s6216_s0] sm:$0x3]  ;;  %v47_v36 = vld [vmem:[%s6214_s1 + $0x98] sm:$0xff]  ;;  %v5116_v37 = vpack.c.bf16 %v336_v25, %v335_v24  ;;  %v5120_v38 = vpack.c.bf16 %v354_v32, %v353_v30  ;;  %v337_v41 = vld [vmem:[%s6215_s2 + $0x10] sm:$0xff] }
  0x16   :  { %3971 = vmatpush1.bf16.msra.mxu0 %v5039_v63  ;;  %3995 = vmatpush1.bf16.msra.mxu1 %v5043_v0  ;;  %v338_v42 = vld [vmem:[%s6215_s2 + $0x18] sm:$0xff]  ;;  %v5131_v43 = vpack.c.bf16 %v47_v36, %v42_v34  ;;  %v355_v45 = vld [vmem:[%s6215_s2 + $0xa0] sm:$0xff]  ;;  %v356_v46 = vld [vmem:[%s6215_s2 + $0xa8] sm:$0xff] }
  0x17   :  { %3973 = vmatprep.subr.bf16.mxu0 %v5045_v1  ;;  %3997 = vmatprep.subr.bf16.mxu1 %v5054_v6  ;;  %6375 = vst [vmem:[#allocation17_spill] sm:$0xff] %v5116_v37  ;;  %6376 = vst [vmem:[#allocation18_spill] sm:$0xff] %v5120_v38  ;;  %v52_v47 = vld [vmem:[%s6214_s1 + $0xc0] sm:$0xff]  ;;  %v57_v48 = vld [vmem:[%s6214_s1 + $0xe8] sm:$0xff]  ;;  %v5149_v49 = vpack.c.bf16 %v338_v42, %v337_v41  ;;  %v5152_v50 = vpack.c.bf16 %v356_v46, %v355_v45 }
  0x18   :  { %654 = vrot.lane.b32.xlu0 %v651_v21, %s4814_s7  ;;  %v339_v54 = vld [vmem:[%s6215_s2 + $0x20] sm:$0xff]  ;;  %v340_v55 = vld [vmem:[%s6215_s2 + $0x28] sm:$0xff]  ;;  %v5161_v56 = vpack.c.bf16 %v57_v48, %v52_v47  ;;  %v357_v58 = vld [vmem:[%s6215_s2 + $0xb0] sm:$0xff] }
  0x19   :  { %6377 = vst [vmem:[#allocation19_spill] sm:$0xff] %v5149_v49  ;;  %6378 = vst [vmem:[#allocation20_spill] sm:$0xff] %v5152_v50  ;;  %v358_v59 = vld [vmem:[%s6215_s2 + $0xb8] sm:$0xff]  ;;  %v62_v60 = vld [vmem:[%s6214_s1 + $0x110] sm:$0xff]  ;;  %v5177_v62 = vpack.c.bf16 %v340_v55, %v339_v54 }
  0x1a   :  { %3975 = vmatpush1.bf16.msra.mxu0 %v5063_v11  ;;  %3999 = vmatpush1.bf16.msra.mxu1 %v5073_v15  ;;  %v67_v61 = vld [vmem:[%s6214_s1 + $0x138] sm:$0xff]  ;;  %v5180_v2 = vpack.c.bf16 %v358_v59, %v357_v58  ;;  %v341_v5 = vld [vmem:[%s6215_s2 + $0x30] sm:$0xff]  ;;  %v359_v12 = vld [vmem:[%s6215_s2 + $0xc0] sm:$0xff] }
  0x1b   :  { %4000 = vmatprep.subr.bf16.mxu0 %v6223_v33  ;;  %4019 = vmatprep.subr.bf16.mxu1 %v5085_v23  ;;  %6379 = vst [vmem:[#allocation21_spill] sm:$0xff] %v5177_v62  ;;  %v342_v7 = vld [vmem:[%s6215_s2 + $0x38] sm:$0xff]  ;;  %v5189_v10 = vpack.c.bf16 %v67_v61, %v62_v60  ;;  %v360_v14 = vld [vmem:[%s6215_s2 + $0xc8] sm:$0xff]  ;;  %v72_v16 = vld [vmem:[%s6214_s1 + $0x160] sm:$0xff] }
  0x1c   :  { %6380 = vst [vmem:[#allocation22_spill] sm:$0xff] %v5180_v2  ;;  %v77_v19 = vld [vmem:[%s6214_s1 + $0x188] sm:$0xff]  ;;  %v5205_v20 = vpack.c.bf16 %v342_v7, %v341_v5  ;;  %v5208_v21 = vpack.c.bf16 %v360_v14, %v359_v12  ;;  %v343_v24 = vld [vmem:[%s6215_s2 + $0x40] sm:$0xff]  ;;  %v361_v32 = vld [vmem:[%s6215_s2 + $0xd0] sm:$0xff] }
  0x1d   :  { %2919 = vmatmul.mubr.msk.f32.vlgmr.msra.gmra.mrb[0].mxu0 %vm114_vm0, %v5097_v28  ;;  %2920 = vmatmul.mubr.msk.f32.vlgmr.msra.gmra.mrb[0].mxu1 %vm114_vm0, %v5097_v28  ;;  %v344_v25 = vld [vmem:[%s6215_s2 + $0x48] sm:$0xff]  ;;  %v5217_v30 = vpack.c.bf16 %v77_v19, %v72_v16  ;;  %v362_v34 = vld [vmem:[%s6215_s2 + $0xd8] sm:$0xff]  ;;  %v82_v36 = vld [vmem:[%s6214_s1 + $0x1b0] sm:$0xff] }
  0x1e   :  { %4002 = vmatpush3.bf16.msra.mxu0 %v5099_v29  ;;  %3534 = vmatprep.mubr.msk.f32.mxu0 %vm4816_vm1, %v6221_v3  ;;  %6381 = vst [vmem:[#allocation23_spill] sm:$0xff] %v5205_v20  ;;  %6382 = vst [vmem:[#allocation24_spill] sm:$0xff] %v5208_v21  ;;  %v87_v41 = vld [vmem:[%s6214_s1 + $0x1d8] sm:$0xff]  ;;  %v383_v42 = vld [vmem:[%s6215_s2 + $0x180] sm:$0xff]  ;;  %v5239_v46 = vpack.c.bf16 %v344_v25, %v343_v24  ;;  %v5242_v47 = vpack.c.bf16 %v362_v34, %v361_v32 }
  0x1f   :  { %4003 = vmatprep.subr.bf16.mxu0 %v6223_v33  ;;  %4021 = vmatpush3.bf16.msra.mxu1 %v5116_v37  ;;  %6383 = vst [vmem:[#allocation25_spill] sm:$0xff] %v5217_v30  ;;  %v384_v45 = vld [vmem:[%s6215_s2 + $0x188] sm:$0xff]  ;;  %v345_v48 = vld [vmem:[%s6215_s2 + $0x50] sm:$0xff]  ;;  %v346_v54 = vld [vmem:[%s6215_s2 + $0x58] sm:$0xff]  ;;  %v5251_v55 = vpack.c.bf16 %v87_v41, %v82_v36 }
  0x20   :  { %4023 = vmatprep.subr.bf16.mxu1 %v5120_v38  ;;  %6384 = vst [vmem:[#allocation26_spill] sm:$0xff] %v5239_v46  ;;  %6385 = vst [vmem:[#allocation27_spill] sm:$0xff] %v5242_v47  ;;  %v363_v58 = vld [vmem:[%s6215_s2 + $0xe0] sm:$0xff]  ;;  %v364_v59 = vld [vmem:[%s6215_s2 + $0xe8] sm:$0xff]  ;;  %v5260_v60 = vpack.c.bf16 %v384_v45, %v383_v42  ;;  %v5275_v14 = vpack.c.bf16 %v346_v54, %v345_v48 }
  0x21   :  { %6386 = vst [vmem:[#allocation28_spill] sm:$0xff] %v5251_v55  ;;  %v367_v61 = vld [vmem:[%s6215_s2 + $0x100] sm:$0xff]  ;;  %v368_v5 = vld [vmem:[%s6215_s2 + $0x108] sm:$0xff]  ;;  %v385_v7 = vld [vmem:[%s6215_s2 + $0x190] sm:$0xff]  ;;  %v5278_v16 = vpack.c.bf16 %v364_v59, %v363_v58 }
  0x22   :  { %4005 = vmatpush3.bf16.msra.mxu0 %v5131_v43  ;;  %6387 = vst [vmem:[#allocation29_spill] sm:$0xff] %v5260_v60  ;;  %v386_v12 = vld [vmem:[%s6215_s2 + $0x198] sm:$0xff]  ;;  %6388 = vst [vmem:[#allocation30_spill] sm:$0xff] %v5275_v14  ;;  %v347_v19 = vld [vmem:[%s6215_s2 + $0x60] sm:$0xff]  ;;  %v5287_v25 = vpack.c.bf16 %v368_v5, %v367_v61 }
  0x23   :  { %4006 = vmatprep.subr.bf16.mxu0 %v6223_v33  ;;  %4025 = vmatpush3.bf16.msra.mxu1 %v5149_v49  ;;  %6389 = vst [vmem:[#allocation31_spill] sm:$0xff] %v5278_v16  ;;  %v348_v24 = vld [vmem:[%s6215_s2 + $0x68] sm:$0xff]  ;;  %v5290_v32 = vpack.c.bf16 %v386_v12, %v385_v7  ;;  %v369_v34 = vld [vmem:[%s6215_s2 + $0x110] sm:$0xff]  ;;  %v370_v36 = vld [vmem:[%s6215_s2 + $0x118] sm:$0xff] }
  0x24   :  { %4027 = vmatprep.subr.bf16.mxu1 %v5152_v50  ;;  %6390 = vst [vmem:[#allocation32_spill] sm:$0xff] %v5287_v25  ;;  %v387_v41 = vld [vmem:[%s6215_s2 + $0x1a0] sm:$0xff]  ;;  %v388_v42 = vld [vmem:[%s6215_s2 + $0x1a8] sm:$0xff]  ;;  %v5305_v45 = vpack.c.bf16 %v348_v24, %v347_v19  ;;  %v5311_v48 = vpack.c.bf16 %v370_v36, %v369_v34  ;;  %v390_v61 = vld [vmem:[%s6215_s2 + $0x1b8] sm:$0xff] }
  0x25   :  { %6391 = vst [vmem:[#allocation33_spill] sm:$0xff] %v5290_v32  ;;  %v5314_v54 = vpack.c.bf16 %v388_v42, %v387_v41  ;;  %v371_v58 = vld [vmem:[%s6215_s2 + $0x120] sm:$0xff]  ;;  %v372_v59 = vld [vmem:[%s6215_s2 + $0x128] sm:$0xff]  ;;  %v373_v12 = vld [vmem:[%s6215_s2 + $0x130] sm:$0xff] }
  0x26   :  { %4008 = vmatpush3.bf16.msra.mxu0 %v5161_v56  ;;  %6392 = vst [vmem:[#allocation34_spill] sm:$0xff] %v5305_v45  ;;  %6393 = vst [vmem:[#allocation35_spill] sm:$0xff] %v5311_v48  ;;  %v5330_v5 = vpack.c.bf16 %v372_v59, %v371_v58  ;;  %v374_v19 = vld [vmem:[%s6215_s2 + $0x138] sm:$0xff]  ;;  %v391_v24 = vld [vmem:[%s6215_s2 + $0x1c0] sm:$0xff] }
  0x27   :  { %4009 = vmatprep.subr.bf16.mxu0 %v6223_v33  ;;  %4029 = vmatpush3.bf16.msra.mxu1 %v5177_v62  ;;  %6394 = vst [vmem:[#allocation36_spill] sm:$0xff] %v5314_v54  ;;  %v392_v34 = vld [vmem:[%s6215_s2 + $0x1c8] sm:$0xff]  ;;  %v5348_v36 = vpack.c.bf16 %v374_v19, %v373_v12  ;;  %v375_v42 = vld [vmem:[%s6215_s2 + $0x140] sm:$0xff]  ;;  %v393_v59 = vld [vmem:[%s6215_s2 + $0x1d0] sm:$0xff] }
  0x28   :  { %4031 = vmatprep.subr.bf16.mxu1 %v5180_v2  ;;  %6395 = vst [vmem:[#allocation37_spill] sm:$0xff] %v5330_v5  ;;  %v5351_v41 = vpack.c.bf16 %v392_v34, %v391_v24  ;;  %v376_v58 = vld [vmem:[%s6215_s2 + $0x148] sm:$0xff]  ;;  %v377_v19 = vld [vmem:[%s6215_s2 + $0x150] sm:$0xff]  ;;  %v378_v24 = vld [vmem:[%s6215_s2 + $0x158] sm:$0xff] }
  0x29   :  { %6397 = vst [vmem:[#allocation39_spill] sm:$0xff] %v5348_v36  ;;  %v395_v34 = vld [vmem:[%s6215_s2 + $0x1e0] sm:$0xff]  ;;  %v380_v3 = vld [vmem:[%s6215_s2 + $0x168] sm:$0xff]  ;;  %v401_v62 = vld [vmem:[%s6215_s2 + $0x210] sm:$0xff] }
  0x2a   :  { %4011 = vmatpush3.bf16.msra.mxu0 %v5189_v10  ;;  %6398 = vst [vmem:[#allocation40_spill] sm:$0xff] %v5351_v41 }
  0x2b   :  { %4012 = vmatprep.subr.bf16.mxu0 %v6223_v33  ;;  %4033 = vmatpush3.bf16.msra.mxu1 %v5205_v20 }
  0x2c   :  { %4035 = vmatprep.subr.bf16.mxu1 %v5208_v21  ;;  %v399_v21 = vld [vmem:[%s6215_s2 + $0x200] sm:$0xff] }
  0x2e   :  { %4014 = vmatpush3.bf16.msra.mxu0 %v5217_v30 }
  0x2f   :  { %4015 = vmatprep.subr.bf16.mxu0 %v6223_v33  ;;  %4037 = vmatpush3.bf16.msra.mxu1 %v5239_v46 }
  0x30   :  { %4039 = vmatprep.subr.bf16.mxu1 %v5242_v47 }
  0x32   :  { %4017 = vmatpush3.bf16.msra.mxu0 %v5251_v55 }
  0x33   :  { %4051 = vmatprep.subr.bf16.mxu0 %v5260_v60  ;;  %4041 = vmatpush3.bf16.msra.mxu1 %v5275_v14 }
  0x34   :  { %4043 = vmatprep.subr.bf16.mxu1 %v5278_v16 }
  0x35   :  { %3535 = vmatmul.mubr.msk.f32.vlgmr.msra.gmra.mrb[2].mxu0 %vm114_vm0, %v5097_v28  ;;  %v389_v28 = vld [vmem:[%s6215_s2 + $0x1b0] sm:$0xff] }
  0x36   :  { %4053 = vmatpush3.bf16.msra.mxu0 %v5287_v25  ;;  %v5333_v7 = vpack.c.bf16 %v390_v61, %v389_v28  ;;  %v394_v28 = vld [vmem:[%s6215_s2 + $0x1d8] sm:$0xff]  ;;  %v5366_v61 = vpack.c.bf16 %v376_v58, %v375_v42  ;;  %v396_v42 = vld [vmem:[%s6215_s2 + $0x1e8] sm:$0xff]  ;;  %v5384_v58 = vpack.c.bf16 %v378_v24, %v377_v19  ;;  %v365_v19 = vld [vmem:[%s6215_s2 + $0xf0] sm:$0xff] }
  0x37   :  { %4055 = vmatprep.subr.bf16.mxu0 %v5290_v32  ;;  %4045 = vmatpush3.bf16.msra.mxu1 %v5305_v45  ;;  %v5369_v12 = vpack.c.bf16 %v394_v28, %v393_v59  ;;  %v5387_v59 = vpack.c.bf16 %v396_v42, %v395_v34  ;;  %v379_v28 = vld [vmem:[%s6215_s2 + $0x160] sm:$0xff]  ;;  %v366_v24 = vld [vmem:[%s6215_s2 + $0xf8] sm:$0xff]  ;;  %v397_v34 = vld [vmem:[%s6215_s2 + $0x1f0] sm:$0xff] }
  0x38   :  { %6396 = vst [vmem:[#allocation38_spill] sm:$0xff] %v5333_v7  ;;  %6399 = vst [vmem:[#allocation41_spill] sm:$0xff] %v5366_v61  ;;  %v5396_v33 = vpack.c.bf16 %v380_v3, %v379_v28  ;;  %v5409_v42 = vpack.c.bf16 %v366_v24, %v365_v19  ;;  %v398_v3 = vld [vmem:[%s6215_s2 + $0x1f8] sm:$0xff]  ;;  %v349_v28 = vld [vmem:[%s6215_s2 + $0x70] sm:$0xff] }
  0x39   :  { %6400 = vst [vmem:[#allocation42_spill] sm:$0xff] %v5369_v12  ;;  %6401 = vst [vmem:[#allocation43_spill] sm:$0xff] %v5384_v58  ;;  %v350_v45 = vld [vmem:[%s6215_s2 + $0x78] sm:$0xff]  ;;  %v5420_v16 = vpack.c.bf16 %v398_v3, %v397_v34  ;;  %v381_v19 = vld [vmem:[%s6215_s2 + $0x170] sm:$0xff]  ;;  %v89_v34 = vlaneseq }
  0x3a   :  { %4057 = vmatpush3.bf16.msra.mxu0 %v5311_v48  ;;  %6402 = vst [vmem:[#allocation44_spill] sm:$0xff] %v5387_v59  ;;  %6403 = vst [vmem:[#allocation45_spill] sm:$0xff] %v5396_v33  ;;  %v5422_v14 = vpack.c.bf16 %v350_v45, %v349_v28  ;;  %v382_v24 = vld [vmem:[%s6215_s2 + $0x178] sm:$0xff]  ;;  %4047 = vmatprep.subr.bf16.mxu1 %v5409_v42  ;;  %v6408_v45 = vmov 0.0|0.0  }
  0x3b   :  { %4059 = vmatprep.subr.bf16.mxu0 %v5314_v54  ;;  %6404 = vst [vmem:[#allocation46_spill] sm:$0xff] %v5409_v42  ;;  %6405 = vst [vmem:[#allocation47_spill] sm:$0xff] %v5420_v16  ;;  %v5438_v3 = vshrl.u32 %v89_v34, 7 }
  0x3c   :  { %6406 = vst [vmem:[#allocation48_spill] sm:$0xff] %v5422_v14  ;;  %4049 = vmatpush3.bf16.msra.mxu1 %v5422_v14 }
  0x3d   :  { %4082 = vmatprep.subr.bf16.mxu1 %v6408_v45  ;;  %v91_v28 = vsub.s32 0, %v5438_v3  ;;  %v95_v14 = vsub.s32 1, %v5438_v3  ;;  %v103_v42 = vsub.s32 3, %v5438_v3 }
  0x3e   :  { %4061 = vmatpush3.bf16.msra.mxu0 %v5330_v5 }
  0x3f   :  { %4063 = vmatprep.subr.bf16.mxu0 %v5333_v7 }
  0x42   :  { %4065 = vmatpush3.bf16.msra.mxu0 %v5348_v36 }
  0x43   :  { %4067 = vmatprep.subr.bf16.mxu0 %v5351_v41  ;;  %v402_v41 = vld [vmem:[%s6215_s2 + $0x218] sm:$0xff] }
  0x46   :  { %4069 = vmatpush3.bf16.msra.mxu0 %v5366_v61 }
  0x47   :  { %4071 = vmatprep.subr.bf16.mxu0 %v5369_v12 }
  0x4a   :  { %4073 = vmatpush3.bf16.msra.mxu0 %v5384_v58 }
  0x4b   :  { %4075 = vmatprep.subr.bf16.mxu0 %v5387_v59 }
  0x4e   :  { %4077 = vmatpush3.bf16.msra.mxu0 %v5396_v33  ;;  %v5431_v33 = vpack.c.bf16 %v382_v24, %v381_v19  ;;  %v5444_v19 = vld [vmem:[%s6217_s5] sm:$0x1f]  ;;  %v99_v24 = vsub.s32 2, %v5438_v3 }
  0x4f   :  { %4079 = vmatprep.subr.bf16.mxu0 %v5420_v16  ;;  %v5456_v34 = vrot.slane %v5444_v19, %v95_v14  ;;  %v5459_v16 = vrot.slane %v5444_v19, %v103_v42 }
  0x50   :  { %6407 = vst [vmem:[#allocation49_spill] sm:$0xff] %v5431_v33 }
  0x52   :  { %4081 = vmatpush3.bf16.msra.mxu0 %v5431_v33  ;;  %v5450_v33 = vrot.slane %v5444_v19, %v91_v28  ;;  %v400_v28 = vld [vmem:[%s6215_s2 + $0x208] sm:$0xff] }
  0x53   :  { %4107 = vmatprep.subr.bf16.mxu0 %v4865_v4  ;;  %v5453_v4 = vrot.slane %v5444_v19, %v99_v24 }
  0x54   :  { %6409 = vst [vmem:[#allocation50_spill] sm:$0xff] %v5450_v33 }
  0x55   :  { %6410 = vst [vmem:[#allocation51_spill] sm:$0xff] %v5453_v4 }
  0xf0   :  { %v184_v47 = vpop.f32.mrb[0].mxu0  ;;  %v255_v59 = vpop.f32.mrb[0].mxu1 }
  0xf1   :  { %v185_v46 = vadd.f32 %v184_v47, %v5450_v33  ;;  %v186_v58 = vpop.f32.mrb[1].mxu0  ;;  %v256_v24 = vadd.f32 %v255_v59, %v5453_v4  ;;  %v257_v20 = vpop.f32.mrb[1].mxu1  ;;  %v5471_v47 = vpack.c.bf16 %v400_v28, %v399_v21  ;;  %v403_v21 = vld [vmem:[%s6215_s2 + $0x220] sm:$0xff] }
  0xf2   :  { %v187_v14 = vadd.f32 %v186_v58, %v5456_v34  ;;  %v258_v42 = vadd.f32 %v257_v20, %v5459_v16  ;;  %v5480_v20 = vpack.c.bf16 %v402_v41, %v401_v62  ;;  %v406_v41 = vld [vmem:[%s6215_s2 + $0x238] sm:$0xff]  ;;  %v408_v58 = vld [vmem:[%s6215_s2 + $0x248] sm:$0xff]  ;;  %v653_v28 = vpop.permute.xlu0 %652 }
  0xf3   :  { %v332_v12 = vmax.f32 %v256_v24, 0.0  ;;  %v330_v33 = vmax.f32 %v185_v46, 0.0  ;;  %v404_v46 = vld [vmem:[%s6215_s2 + $0x228] sm:$0xff]  ;;  %v409_v24 = vld [vmem:[%s6215_s2 + $0x250] sm:$0xff] }
  0xf4   :  { %v331_v61 = vmax.f32 %v187_v14, 0.0  ;;  %v333_v2 = vmax.f32 %v258_v42, 0.0  ;;  %v5495_v62 = vpack.c.bf16 %v404_v46, %v403_v21  ;;  %v410_v14 = vld [vmem:[%s6215_s2 + $0x258] sm:$0xff]  ;;  %v107_v42 = vsub.s32 4, %v5438_v3 }
  0xf5   :  { %v5532_v21 = vpack.c.bf16 %v410_v14, %v409_v24 }
  0xf6   :  { %485 = vmatprep.mubr.f32.mxu1 %v331_v61  ;;  %555 = vmatprep.mubr.f32.mxu0 %v333_v2  ;;  %v405_v2 = vld [vmem:[%s6215_s2 + $0x230] sm:$0xff]  ;;  %v655_v3 = vpop.permute.xlu0 %654 }
  0xf7   :  { %486 = vmatmul.mubr.f32.vlgmr.msra.gmra.mrb[2].mxu1 %v330_v33  ;;  %556 = vmatmul.mubr.f32.vlgmr.msra.gmra.mrb[4].mxu0 %v332_v12  ;;  %v6411_v33 = vmov 0.0   ;;  %v5507_v61 = vpack.c.bf16 %v406_v41, %v405_v2  ;;  %v407_v12 = vld [vmem:[%s6215_s2 + $0x240] sm:$0xff]  ;;  %v412_v41 = vld [vmem:[%s6215_s2 + $0x268] sm:$0xff]  ;;  %v657_v14 = vsel %vm656_vm2, %v653_v28, %v655_v3  ;;  %v6416_v3 = vld [vmem:[#allocation42_spill] sm:$0xff] }
  0xf8   :  { %4084 = vmatpush3.bf16.msra.mxu1 %v5471_v47  ;;  %4109 = vmatpush1.bf16.msra.mxu0 %v4878_v9  ;;  %v5519_v59 = vpack.c.bf16 %v408_v58, %v407_v12  ;;  %v411_v2 = vld [vmem:[%s6215_s2 + $0x260] sm:$0xff]  ;;  %v5544_v58 = vrot.slane %v5444_v19, %v107_v42 }
  0xf9   :  { %4085 = vmatprep.subr.bf16.mxu1 %v6408_v45  ;;  %4111 = vmatprep.subr.bf16.mxu0 %v4903_v17  ;;  %v5547_v24 = vpack.c.bf16 %v412_v41, %v411_v2  ;;  %v6414_v2 = vld [vmem:[#allocation22_spill] sm:$0xff]  ;;  %v6415_v41 = vld [vmem:[#allocation41_spill] sm:$0xff] }
  0xfa   :  { %724 = vmatprep.mubr.f32.mxu0 %v6411_v33  ;;  %3569 = vmatprep.mubr.msk.f32.mxu1 %vm4816_vm1, %v6411_v33 }
  0xfc   :  { %4087 = vmatpush3.bf16.msra.mxu1 %v5480_v20  ;;  %4113 = vmatpush1.bf16.msra.mxu0 %v4917_v22 }
  0xfd   :  { %4088 = vmatprep.subr.bf16.mxu1 %v6408_v45  ;;  %4115 = vmatprep.subr.bf16.mxu0 %v4932_v27 }
 0x100   :  { %4090 = vmatpush3.bf16.msra.mxu1 %v5495_v62  ;;  %4117 = vmatpush1.bf16.msra.mxu0 %v4955_v35 }
 0x101   :  { %4091 = vmatprep.subr.bf16.mxu1 %v6408_v45  ;;  %4119 = vmatprep.subr.bf16.mxu0 %v4970_v40 }
 0x104   :  { %4093 = vmatpush3.bf16.msra.mxu1 %v5507_v61  ;;  %4121 = vmatpush1.bf16.msra.mxu0 %v5003_v51 }
 0x105   :  { %4094 = vmatprep.subr.bf16.mxu1 %v6408_v45  ;;  %4123 = vmatprep.subr.bf16.mxu0 %v5009_v53 }
 0x108   :  { %4096 = vmatpush3.bf16.msra.mxu1 %v5519_v59  ;;  %v326_v46 = vpop.f32.mrb[2].mxu0  ;;  %4125 = vmatpush1.bf16.msra.mxu0 %v5039_v63 }
 0x109   :  { %4097 = vmatprep.subr.bf16.mxu1 %v6408_v45  ;;  %v3536_v12 = vpop.f32.mrb[3].mxu0  ;;  %4127 = vmatprep.subr.bf16.mxu0 %v5045_v1  ;;  %v414_v1 = vld [vmem:[%s6215_s2 + $0x278] sm:$0xff]  ;;  %v327_v19 = vadd.f32 %v326_v46, %v5544_v58  ;;  %v6413_v46 = vld [vmem:[#allocation21_spill] sm:$0xff] }
 0x10a   :  { %v413_v12 = vld [vmem:[%s6215_s2 + $0x270] sm:$0xff] }
 0x10b   :  { %v5561_v42 = vpack.c.bf16 %v414_v1, %v413_v12  ;;  %v334_v28 = vmax.f32 %v327_v19, 0.0  ;;  %v6412_v1 = vld [vmem:[#allocation40_spill] sm:$0xff]  ;;  %v6419_v19 = vld [vmem:[#allocation43_spill] sm:$0xff] }
 0x10c   :  { %4099 = vmatpush3.bf16.msra.mxu1 %v5532_v21  ;;  %4129 = vmatpush1.bf16.msra.mxu0 %v5063_v11  ;;  %v6418_v12 = vld [vmem:[#allocation24_spill] sm:$0xff] }
 0x10d   :  { %4100 = vmatprep.subr.bf16.mxu1 %v6408_v45  ;;  %4154 = vmatprep.subr.bf16.mxu0 %v6408_v45 }
 0x10f   :  { %2924 = vmatmul.mubr.msk.f32.vlgmr.msra.gmra.mrb[6].mxu0 %vm114_vm0, %v657_v14 }
 0x110   :  { %4102 = vmatpush3.bf16.msra.mxu1 %v5547_v24  ;;  %4156 = vmatpush3.bf16.msra.mxu0 %v5099_v29 }
 0x111   :  { %4103 = vmatprep.subr.bf16.mxu1 %v6408_v45  ;;  %4157 = vmatprep.subr.bf16.mxu0 %v6408_v45 }
 0x112   :  { %3596 = vmatprep.mubr.msk.f32.mxu0 %vm4816_vm1, %v6411_v33 }
 0x114   :  { %4105 = vmatpush3.bf16.msra.mxu1 %v5561_v42  ;;  %4159 = vmatpush3.bf16.msra.mxu0 %v5131_v43 }
 0x115   :  { %4131 = vmatprep.subr.bf16.mxu1 %v4876_v8  ;;  %4160 = vmatprep.subr.bf16.mxu0 %v6408_v45 }
 0x117   :  { %3570 = vmatmul.mubr.f32.vlgmr.msra.gmra.mrb[4].mxu1 %v334_v28  ;;  %v6420_v28 = vld [vmem:[#allocation44_spill] sm:$0xff] }
 0x118   :  { %4133 = vmatpush1.bf16.msra.mxu1 %v4890_v13  ;;  %795 = vmatprep.mubr.f32.mxu1 %v6411_v33 }
 0x119   :  { %4162 = vmatpush3.bf16.msra.mxu0 %v5161_v56  ;;  %4135 = vmatprep.subr.bf16.mxu1 %v4905_v18 }
 0x11a   :  { %4163 = vmatprep.subr.bf16.mxu0 %v6408_v45 }
 0x11c   :  { %4137 = vmatpush1.bf16.msra.mxu1 %v4930_v26 }
 0x11d   :  { %4165 = vmatpush3.bf16.msra.mxu0 %v5189_v10  ;;  %4139 = vmatprep.subr.bf16.mxu1 %v4943_v31 }
 0x11e   :  { %4166 = vmatprep.subr.bf16.mxu0 %v6408_v45 }
 0x120   :  { %4141 = vmatpush1.bf16.msra.mxu1 %v4968_v39  ;;  %v6432_v39 = vld [vmem:[#allocation50_spill] sm:$0xff] }
 0x121   :  { %4168 = vmatpush3.bf16.msra.mxu0 %v5217_v30  ;;  %4143 = vmatprep.subr.bf16.mxu1 %v4982_v44 }
 0x122   :  { %4169 = vmatprep.subr.bf16.mxu0 %v6408_v45 }
 0x124   :  { %4145 = vmatpush1.bf16.msra.mxu1 %v5007_v52 }
 0x125   :  { %4171 = vmatpush3.bf16.msra.mxu0 %v5251_v55  ;;  %4147 = vmatprep.subr.bf16.mxu1 %v5021_v57 }
 0x126   :  { %4205 = vmatprep.subr.bf16.mxu0 %v5260_v60 }
 0x128   :  { %3597 = vmatmul.mubr.msk.f32.vlgmr.msra.gmra.mrb[8].mxu0 %vm114_vm0, %v657_v14  ;;  %4149 = vmatpush1.bf16.msra.mxu1 %v5043_v0 }
 0x129   :  { %4151 = vmatprep.subr.bf16.mxu1 %v5054_v6  ;;  %4207 = vmatpush3.bf16.msra.mxu0 %v5287_v25 }
 0x12a   :  { %4209 = vmatprep.subr.bf16.mxu0 %v5290_v32 }
 0x12c   :  { %4153 = vmatpush1.bf16.msra.mxu1 %v5073_v15  ;;  %v6430_v15 = vld [vmem:[#allocation48_spill] sm:$0xff] }
 0x12d   :  { %4173 = vmatprep.subr.bf16.mxu1 %v5085_v23  ;;  %4211 = vmatpush3.bf16.msra.mxu0 %v5311_v48  ;;  %v6427_v23 = vld [vmem:[#allocation49_spill] sm:$0xff] }
 0x12e   :  { %4213 = vmatprep.subr.bf16.mxu0 %v5314_v54 }
 0x12f   :  { %2925 = vmatmul.mubr.msk.f32.vlgmr.msra.gmra.mrb[6].mxu1 %vm114_vm0, %v657_v14  ;;  %v6417_v14 = vld [vmem:[#allocation23_spill] sm:$0xff] }
 0x130   :  { %4175 = vmatpush3.bf16.msra.mxu1 %v5116_v37  ;;  %v6426_v37 = vld [vmem:[#allocation31_spill] sm:$0xff] }
 0x131   :  { %4177 = vmatprep.subr.bf16.mxu1 %v5120_v38  ;;  %4215 = vmatpush3.bf16.msra.mxu0 %v5330_v5  ;;  %v6423_v38 = vld [vmem:[#allocation45_spill] sm:$0xff] }
 0x132   :  { %4217 = vmatprep.subr.bf16.mxu0 %v5333_v7 }
 0x134   :  { %4179 = vmatpush3.bf16.msra.mxu1 %v5149_v49  ;;  %v6422_v49 = vld [vmem:[#allocation27_spill] sm:$0xff] }
 0x135   :  { %4181 = vmatprep.subr.bf16.mxu1 %v5152_v50  ;;  %4219 = vmatpush3.bf16.msra.mxu0 %v5348_v36  ;;  %v6421_v50 = vld [vmem:[#allocation26_spill] sm:$0xff] }
 0x136   :  { %4221 = vmatprep.subr.bf16.mxu0 %v6412_v1 }
 0x138   :  { %4183 = vmatpush3.bf16.msra.mxu1 %v6413_v46  ;;  %v6424_v46 = vld [vmem:[#allocation47_spill] sm:$0xff] }
 0x139   :  { %4185 = vmatprep.subr.bf16.mxu1 %v6414_v2  ;;  %4223 = vmatpush3.bf16.msra.mxu0 %v6415_v41  ;;  %v6425_v2 = vld [vmem:[#allocation30_spill] sm:$0xff] }
 0x13a   :  { %4225 = vmatprep.subr.bf16.mxu0 %v6416_v3 }
 0x13c   :  { %4187 = vmatpush3.bf16.msra.mxu1 %v6417_v14  ;;  %v6429_v14 = vld [vmem:[#allocation46_spill] sm:$0xff] }
 0x13d   :  { %4189 = vmatprep.subr.bf16.mxu1 %v6418_v12  ;;  %4227 = vmatpush3.bf16.msra.mxu0 %v6419_v19  ;;  %v6428_v12 = vld [vmem:[#allocation34_spill] sm:$0xff] }
 0x13e   :  { %4229 = vmatprep.subr.bf16.mxu0 %v6420_v28 }
 0x140   :  { %4191 = vmatpush3.bf16.msra.mxu1 %v6421_v50  ;;  %v5633_v50 = vld [vmem:[%s6217_s5 + $0x5] ss:$0 sm:$0xff] }
 0x141   :  { %4193 = vmatprep.subr.bf16.mxu1 %v6422_v49  ;;  %4231 = vmatpush3.bf16.msra.mxu0 %v6423_v38  ;;  %v2928_v49 = vld.sshfl [vmem:[%s6216_s0 + $0x2] sm:$0x33 pattern:$0x76325410]  ;;  %6431 = vst [vmem:[#allocation52_spill] sm:$0xff] %v5633_v50 }
 0x142   :  { %4233 = vmatprep.subr.bf16.mxu0 %v6424_v46  ;;  %1182 = vrot.lane.b32.xlu1 %v2928_v49, %s4817_s16 }
 0x144   :  { %4195 = vmatpush3.bf16.msra.mxu1 %v6425_v2  ;;  %v1181_v2 = vcombine.high %v2928_v49, %v2928_v49 }
 0x145   :  { %4197 = vmatprep.subr.bf16.mxu1 %v6426_v37  ;;  %4235 = vmatpush3.bf16.msra.mxu0 %v6427_v23 }
 0x146   :  { %4260 = vmatprep.subr.bf16.mxu0 %v6408_v45  ;;  %1184 = vrot.lane.b32.xlu1 %v1181_v2, %s4817_s16 }
 0x148   :  { %4199 = vmatpush3.bf16.msra.mxu1 %v6428_v12 }
 0x149   :  { %4201 = vmatprep.subr.bf16.mxu1 %v6429_v14 }
 0x14c   :  { %4203 = vmatpush3.bf16.msra.mxu1 %v6430_v15 }
 0x14d   :  { %4236 = vmatprep.subr.bf16.mxu1 %v6408_v45 }
 0x1ca   :  { %v2992_v37 = vpop.f32.mrb[2].mxu1  ;;  %v3027_v14 = vpop.f32.mrb[4].mxu0 }
 0x1cb   :  { %v2993_v12 = vpop.f32.mrb[3].mxu1  ;;  %v3028_v15 = vpop.f32.mrb[5].mxu0 }
 0x1cc   :  { %v2994_v6 = vadd.f32 %v2993_v12, %v2992_v37  ;;  %v3029_v0 = vadd.f32 %v3028_v15, %v3027_v14  ;;  %v6434_v14 = vld [vmem:[#allocation2_spill] sm:$0xff]  ;;  %v6435_v12 = vld [vmem:[#allocation13_spill] sm:$0xff] }
 0x1ce   :  { %v488_v57 = vadd.f32 %v2994_v6, %v5633_v50 }
 0x1d0   :  { %v558_v52 = vadd.f32 %v3029_v0, %v488_v57 }
 0x1e2   :  { %v726_v44 = vpop.f32.mrb[6].mxu0 }
 0x1e3   :  { %v727_v31 = vadd.f32 %v726_v44, %v6432_v39  ;;  %v728_v26 = vpop.f32.mrb[7].mxu0 }
 0x1e4   :  { %v729_v49 = vadd.f32 %v728_v26, %v5456_v34 }
 0x1e5   :  { %v872_v2 = vmax.f32 %v727_v31, 0.0 }
 0x1e6   :  { %v873_v18 = vmax.f32 %v729_v49, 0.0  ;;  %v1183_v49 = vpop.permute.xlu1 %1182 }
 0x1e8   :  { %941 = vmatprep.mubr.f32.mxu1 %v873_v18 }
 0x1e9   :  { %942 = vmatmul.mubr.f32.vlgmr.msra.gmra.mrb[8].mxu1 %v872_v2  ;;  %v1088_v2 = vld [vmem:[%s6218_s3 + $0x50] sm:$0xff] }
 0x1ea   :  { %v627_v13 = vpop.f32.mrb[4].mxu1  ;;  %4238 = vmatpush3.bf16.msra.mxu1 %v5471_v47  ;;  %3631 = vmatprep.mubr.msk.f32.mxu1 %vm4816_vm1, %v6411_v33 }
 0x1eb   :  { %v5639_v23 = vadd.f32 %v627_v13, %v558_v52  ;;  %v3571_v37 = vpop.f32.mrb[5].mxu1  ;;  %4239 = vmatprep.subr.bf16.mxu1 %v6408_v45 }
 0x1ec   :  { %v1089_v37 = vld [vmem:[%s6218_s3 + $0x58] sm:$0xff] }
 0x1ed   :  { %6433 = vst [vmem:[#allocation50_spill] sm:$0xff] %v5639_v23 }
 0x1ee   :  { %4241 = vmatpush3.bf16.msra.mxu1 %v5480_v20 }
 0x1ef   :  { %4242 = vmatprep.subr.bf16.mxu1 %v6408_v45 }
 0x1f2   :  { %4244 = vmatpush3.bf16.msra.mxu1 %v5495_v62 }
 0x1f3   :  { %4245 = vmatprep.subr.bf16.mxu1 %v6408_v45 }
 0x1f6   :  { %4247 = vmatpush3.bf16.msra.mxu1 %v5507_v61 }
 0x1f7   :  { %4248 = vmatprep.subr.bf16.mxu1 %v6408_v45 }
 0x1fa   :  { %4250 = vmatpush3.bf16.msra.mxu1 %v5519_v59 }
 0x1fb   :  { %v868_v13 = vpop.f32.mrb[8].mxu0  ;;  %4251 = vmatprep.subr.bf16.mxu1 %v6408_v45 }
 0x1fc   :  { %v3598_v18 = vpop.f32.mrb[9].mxu0  ;;  %v869_v52 = vadd.f32 %v868_v13, %v5544_v58  ;;  %v1090_v13 = vld [vmem:[%s6218_s3 + $0x60] sm:$0xff] }
 0x1fd   :  { %v4261_v18 = vpack.c.bf16 %v1089_v37, %v1088_v2  ;;  %v1096_v37 = vld [vmem:[%s6218_s3 + $0x90] sm:$0xff] }
 0x1fe   :  { %4253 = vmatpush3.bf16.msra.mxu1 %v5532_v21  ;;  %v876_v15 = vmax.f32 %v869_v52, 0.0 }
 0x1ff   :  { %4254 = vmatprep.subr.bf16.mxu1 %v6408_v45 }
 0x202   :  { %v797_v26 = vpop.f32.mrb[6].mxu1  ;;  %4256 = vmatpush3.bf16.msra.mxu1 %v5547_v24 }
 0x203   :  { %v798_v31 = vadd.f32 %v797_v26, %v5453_v4  ;;  %v799_v44 = vpop.f32.mrb[7].mxu1  ;;  %4257 = vmatprep.subr.bf16.mxu1 %v6408_v45  ;;  %v1091_v26 = vld [vmem:[%s6218_s3 + $0x68] sm:$0xff] }
 0x204   :  { %v800_v57 = vadd.f32 %v799_v44, %v5459_v16  ;;  %v4264_v44 = vpack.c.bf16 %v1091_v26, %v1090_v13  ;;  %v1097_v13 = vld [vmem:[%s6218_s3 + $0x98] sm:$0xff]  ;;  %v6436_v26 = vld [vmem:[#allocation49_spill] sm:$0xff] }
 0x205   :  { %v874_v6 = vmax.f32 %v798_v31, 0.0  ;;  %v1185_v31 = vpop.permute.xlu1 %1184 }
 0x206   :  { %v875_v0 = vmax.f32 %v800_v57, 0.0  ;;  %4259 = vmatpush3.bf16.msra.mxu1 %v5561_v42  ;;  %v5688_v52 = vsel %vm1186_vm3, %v1183_v49, %v1185_v31  ;;  %v1092_v57 = vld [vmem:[%s6218_s3 + $0x70] sm:$0xff]  ;;  %v1095_v49 = vld [vmem:[%s6218_s3 + $0x88] sm:$0xff] }
 0x207   :  { %4276 = vmatprep.subr.bf16.mxu1 %v6434_v14  ;;  %v2932_v31 = vld.sshfl [vmem:[%s6216_s0 + $0x4] sm:$0x3 pattern:$0x76325410] }
 0x208   :  { %1011 = vmatprep.mubr.f32.mxu0 %v875_v0  ;;  %v1093_v0 = vld [vmem:[%s6218_s3 + $0x78] sm:$0xff]  ;;  %1637 = vrot.lane.b32.xlu0 %v2932_v31, %s4818_s15  ;;  %v6438_v31 = vld [vmem:[#allocation5_spill] sm:$0xff] }
 0x209   :  { %1012 = vmatmul.mubr.f32.vlgmr.msra.gmra.mrb[10].mxu0 %v874_v6  ;;  %3632 = vmatmul.mubr.f32.vlgmr.msra.gmra.mrb[10].mxu1 %v876_v15  ;;  %v4267_v6 = vpack.c.bf16 %v1093_v0, %v1092_v57  ;;  %v1094_v15 = vld [vmem:[%s6218_s3 + $0x80] sm:$0xff] }
 0x20a   :  { %3654 = vmatprep.mubr.msk.f32.mxu0 %vm4816_vm1, %v6411_v33  ;;  %4278 = vmatpush1.bf16.msra.mxu1 %v4878_v9  ;;  %v4270_v2 = vpack.c.bf16 %v1095_v49, %v1094_v15 }
 0x20b   :  { %1254 = vmatprep.mubr.f32.mxu1 %v6411_v33  ;;  %4280 = vmatprep.subr.bf16.mxu1 %v4903_v17 }
 0x20c   :  { %4262 = vmatpush3.bf16.msra.mxu0 %v4261_v18  ;;  %v4273_v18 = vpack.c.bf16 %v1097_v13, %v1096_v37 }
 0x20d   :  { %4263 = vmatprep.subr.bf16.mxu0 %v6408_v45 }
 0x20e   :  { %4282 = vmatpush1.bf16.msra.mxu1 %v4917_v22 }
 0x20f   :  { %4284 = vmatprep.subr.bf16.mxu1 %v4932_v27 }
 0x210   :  { %4265 = vmatpush3.bf16.msra.mxu0 %v4264_v44 }
 0x211   :  { %4266 = vmatprep.subr.bf16.mxu0 %v6408_v45 }
 0x212   :  { %4286 = vmatpush1.bf16.msra.mxu1 %v4955_v35 }
 0x213   :  { %4288 = vmatprep.subr.bf16.mxu1 %v4970_v40 }
 0x214   :  { %4268 = vmatpush3.bf16.msra.mxu0 %v4267_v6 }
 0x215   :  { %4269 = vmatprep.subr.bf16.mxu0 %v6408_v45 }
 0x216   :  { %4290 = vmatpush1.bf16.msra.mxu1 %v5003_v51 }
 0x217   :  { %4292 = vmatprep.subr.bf16.mxu1 %v5009_v53 }
 0x218   :  { %4271 = vmatpush3.bf16.msra.mxu0 %v4270_v2 }
 0x219   :  { %4272 = vmatprep.subr.bf16.mxu0 %v6408_v45 }
 0x21a   :  { %4294 = vmatpush1.bf16.msra.mxu1 %v5039_v63 }
 0x21b   :  { %4296 = vmatprep.subr.bf16.mxu1 %v6435_v12 }
 0x21c   :  { %4274 = vmatpush3.bf16.msra.mxu0 %v4273_v18 }
 0x21d   :  { %4300 = vmatprep.subr.bf16.mxu0 %v4876_v8 }
 0x21e   :  { %4298 = vmatpush1.bf16.msra.mxu1 %v5063_v11 }
 0x21f   :  { %4323 = vmatprep.subr.bf16.mxu1 %v6408_v45 }
 0x221   :  { %2929 = vmatmul.mubr.msk.f32.vlgmr.msra.gmra.mrb[12].mxu1 %vm114_vm0, %v5688_v52 }
 0x222   :  { %4325 = vmatpush3.bf16.msra.mxu1 %v5099_v29  ;;  %3681 = vmatprep.mubr.msk.f32.mxu1 %vm4816_vm1, %v6411_v33 }
 0x223   :  { %4326 = vmatprep.subr.bf16.mxu1 %v6408_v45 }
 0x226   :  { %4328 = vmatpush3.bf16.msra.mxu1 %v5131_v43 }
 0x227   :  { %4329 = vmatprep.subr.bf16.mxu1 %v6408_v45 }
 0x22a   :  { %4331 = vmatpush3.bf16.msra.mxu1 %v5161_v56 }
 0x22b   :  { %4332 = vmatprep.subr.bf16.mxu1 %v6408_v45 }
 0x22e   :  { %4334 = vmatpush3.bf16.msra.mxu1 %v5189_v10 }
 0x22f   :  { %4335 = vmatprep.subr.bf16.mxu1 %v6408_v45 }
 0x232   :  { %4337 = vmatpush3.bf16.msra.mxu1 %v5217_v30 }
 0x233   :  { %4338 = vmatprep.subr.bf16.mxu1 %v6408_v45 }
 0x236   :  { %4340 = vmatpush3.bf16.msra.mxu1 %v5251_v55 }
 0x237   :  { %4374 = vmatprep.subr.bf16.mxu1 %v5260_v60 }
 0x239   :  { %3682 = vmatmul.mubr.msk.f32.vlgmr.msra.gmra.mrb[14].mxu1 %vm114_vm0, %v5688_v52 }
 0x23a   :  { %4376 = vmatpush3.bf16.msra.mxu1 %v5287_v25  ;;  %v6463_v25 = vld [vmem:[#allocation48_spill] sm:$0xff] }
 0x23b   :  { %4378 = vmatprep.subr.bf16.mxu1 %v5290_v32 }
 0x23e   :  { %4380 = vmatpush3.bf16.msra.mxu1 %v5311_v48 }
 0x23f   :  { %4382 = vmatprep.subr.bf16.mxu1 %v5314_v54 }
 0x242   :  { %4384 = vmatpush3.bf16.msra.mxu1 %v5330_v5  ;;  %v6462_v5 = vld [vmem:[#allocation46_spill] sm:$0xff] }
 0x243   :  { %4386 = vmatprep.subr.bf16.mxu1 %v5333_v7  ;;  %v6461_v7 = vld [vmem:[#allocation34_spill] sm:$0xff] }
 0x246   :  { %4388 = vmatpush3.bf16.msra.mxu1 %v5348_v36  ;;  %v6460_v36 = vld [vmem:[#allocation31_spill] sm:$0xff] }
 0x247   :  { %4390 = vmatprep.subr.bf16.mxu1 %v6412_v1  ;;  %v6458_v1 = vld [vmem:[#allocation27_spill] sm:$0xff] }
 0x24a   :  { %4392 = vmatpush3.bf16.msra.mxu1 %v6415_v41  ;;  %v6457_v41 = vld [vmem:[#allocation26_spill] sm:$0xff] }
 0x24b   :  { %4394 = vmatprep.subr.bf16.mxu1 %v6416_v3  ;;  %v6456_v3 = vld [vmem:[#allocation24_spill] sm:$0xff] }
 0x24e   :  { %4396 = vmatpush3.bf16.msra.mxu1 %v6419_v19  ;;  %v6455_v19 = vld [vmem:[#allocation23_spill] sm:$0xff] }
 0x24f   :  { %4398 = vmatprep.subr.bf16.mxu1 %v6420_v28  ;;  %v6454_v28 = vld [vmem:[#allocation22_spill] sm:$0xff] }
 0x252   :  { %4400 = vmatpush3.bf16.msra.mxu1 %v6423_v38  ;;  %v6453_v38 = vld [vmem:[#allocation21_spill] sm:$0xff] }
 0x253   :  { %4402 = vmatprep.subr.bf16.mxu1 %v6424_v46  ;;  %v6441_v46 = vld [vmem:[#allocation8_spill] sm:$0xff] }
 0x256   :  { %4404 = vmatpush3.bf16.msra.mxu1 %v6436_v26  ;;  %v6437_v26 = vld [vmem:[#allocation4_spill] sm:$0xff] }
 0x257   :  { %4430 = vmatprep.subr.bf16.mxu1 %v6434_v14 }
 0x2bc   :  { %v3092_v44 = vpop.f32.mrb[8].mxu1 }
 0x2bd   :  { %v3093_v57 = vpop.f32.mrb[9].mxu1 }
 0x2be   :  { %v3094_v0 = vadd.f32 %v3093_v57, %v3092_v44  ;;  %v6439_v44 = vld [vmem:[#allocation6_spill] sm:$0xff]  ;;  %v6440_v57 = vld [vmem:[#allocation7_spill] sm:$0xff] }
 0x2c0   :  { %v944_v2 = vadd.f32 %v3094_v0, %v5633_v50  ;;  %v6442_v0 = vld [vmem:[#allocation9_spill] sm:$0xff]  ;;  %v6452_v50 = vld [vmem:[#allocation20_spill] sm:$0xff] }
 0x2dc   :  { %v3127_v6 = vpop.f32.mrb[10].mxu0  ;;  %v1083_v15 = vpop.f32.mrb[10].mxu1 }
 0x2dd   :  { %v3128_v49 = vpop.f32.mrb[11].mxu0  ;;  %v3633_v37 = vpop.f32.mrb[11].mxu1 }
 0x2de   :  { %v3129_v13 = vadd.f32 %v3128_v49, %v3127_v6  ;;  %v6443_v6 = vld [vmem:[#allocation10_spill] sm:$0xff]  ;;  %v6447_v49 = vld [vmem:[#allocation15_spill] sm:$0xff]  ;;  %v6449_v37 = vld [vmem:[#allocation17_spill] sm:$0xff] }
 0x2e0   :  { %v1014_v18 = vadd.f32 %v3129_v13, %v944_v2  ;;  %v6448_v2 = vld [vmem:[#allocation16_spill] sm:$0xff]  ;;  %v6450_v13 = vld [vmem:[#allocation18_spill] sm:$0xff] }
 0x2e2   :  { %v1084_v23 = vadd.f32 %v1083_v15, %v1014_v18  ;;  %v6444_v15 = vld [vmem:[#allocation11_spill] sm:$0xff] }
 0x2e3   :  { %v6451_v18 = vld [vmem:[#allocation19_spill] sm:$0xff] }
 0x2e4   :  { %v1087_v14 = vmax.f32 %v1084_v23, 0.0  ;;  %v6445_v23 = vld [vmem:[#allocation12_spill] sm:$0xff] }
 0x2e6   :  { %3655 = vmatmul.mubr.msk.f32.vlgmr.msra.gmra.mrb[12].mxu0 %vm1098_vm4, %v1087_v14  ;;  %v6446_v14 = vld [vmem:[#allocation14_spill] sm:$0xff] }
 0x2e7   :  { %4302 = vmatpush1.bf16.msra.mxu0 %v6437_v26  ;;  %1325 = vmatprep.mubr.f32.mxu0 %v6411_v33 }
 0x2e8   :  { %4304 = vmatprep.subr.bf16.mxu0 %v6438_v31 }
 0x2eb   :  { %4306 = vmatpush1.bf16.msra.mxu0 %v6439_v44 }
 0x2ec   :  { %4308 = vmatprep.subr.bf16.mxu0 %v6440_v57 }
 0x2ef   :  { %4310 = vmatpush1.bf16.msra.mxu0 %v6441_v46 }
 0x2f0   :  { %4312 = vmatprep.subr.bf16.mxu0 %v6442_v0 }
 0x2f3   :  { %4314 = vmatpush1.bf16.msra.mxu0 %v6443_v6 }
 0x2f4   :  { %4316 = vmatprep.subr.bf16.mxu0 %v6444_v15  ;;  %v1256_v54 = vpop.f32.mrb[12].mxu1 }
 0x2f5   :  { %v1257_v48 = vadd.f32 %v1256_v54, %v6432_v39  ;;  %v1258_v32 = vpop.f32.mrb[13].mxu1 }
 0x2f6   :  { %v1259_v60 = vadd.f32 %v1258_v32, %v5456_v34 }
 0x2f7   :  { %4318 = vmatpush1.bf16.msra.mxu0 %v6445_v23  ;;  %v1402_v55 = vmax.f32 %v1257_v48, 0.0  ;;  %v1638_v48 = vpop.permute.xlu0 %1637 }
 0x2f8   :  { %4320 = vmatprep.subr.bf16.mxu0 %v6446_v14  ;;  %v1403_v30 = vmax.f32 %v1259_v60, 0.0 }
 0x2fb   :  { %4322 = vmatpush1.bf16.msra.mxu0 %v6447_v49 }
 0x2fc   :  { %4342 = vmatprep.subr.bf16.mxu0 %v6448_v2 }
 0x2fe   :  { %2930 = vmatmul.mubr.msk.f32.vlgmr.msra.gmra.mrb[14].mxu0 %vm114_vm0, %v5688_v52  ;;  %v6459_v52 = vld [vmem:[#allocation30_spill] sm:$0xff] }
 0x2ff   :  { %4344 = vmatpush3.bf16.msra.mxu0 %v6449_v37  ;;  %1471 = vmatprep.mubr.f32.mxu0 %v1403_v30 }
 0x300   :  { %4346 = vmatprep.subr.bf16.mxu0 %v6450_v13 }
 0x303   :  { %4348 = vmatpush3.bf16.msra.mxu0 %v6451_v18 }
 0x304   :  { %4350 = vmatprep.subr.bf16.mxu0 %v6452_v50 }
 0x307   :  { %4352 = vmatpush3.bf16.msra.mxu0 %v6453_v38 }
 0x308   :  { %4354 = vmatprep.subr.bf16.mxu0 %v6454_v28 }
 0x30b   :  { %4356 = vmatpush3.bf16.msra.mxu0 %v6455_v19 }
 0x30c   :  { %4358 = vmatprep.subr.bf16.mxu0 %v6456_v3  ;;  %v1398_v30 = vpop.f32.mrb[14].mxu1 }
 0x30d   :  { %v3683_v60 = vpop.f32.mrb[15].mxu1 }
 0x30f   :  { %4360 = vmatpush3.bf16.msra.mxu0 %v6457_v41 }
 0x310   :  { %4362 = vmatprep.subr.bf16.mxu0 %v6458_v1 }
 0x313   :  { %4364 = vmatpush3.bf16.msra.mxu0 %v6459_v52 }
 0x314   :  { %4366 = vmatprep.subr.bf16.mxu0 %v6460_v36 }
 0x317   :  { %4368 = vmatpush3.bf16.msra.mxu0 %v6461_v7 }
 0x318   :  { %4370 = vmatprep.subr.bf16.mxu0 %v6462_v5 }
 0x31b   :  { %4372 = vmatpush3.bf16.msra.mxu0 %v6463_v25 }
 0x31c   :  { %4405 = vmatprep.subr.bf16.mxu0 %v6408_v45 }
 0x31e   :  { %1472 = vmatmul.mubr.f32.vlgmr.msra.gmra.mrb[16].mxu0 %v1402_v55  ;;  %v1399_v55 = vadd.f32 %v1398_v30, %v5544_v58 }
 0x31f   :  { %4407 = vmatpush3.bf16.msra.mxu0 %v5471_v47  ;;  %3716 = vmatprep.mubr.msk.f32.mxu0 %vm4816_vm1, %v6411_v33 }
 0x320   :  { %4408 = vmatprep.subr.bf16.mxu0 %v6408_v45  ;;  %v1406_v32 = vmax.f32 %v1399_v55, 0.0 }
 0x323   :  { %4410 = vmatpush3.bf16.msra.mxu0 %v5480_v20 }
 0x324   :  { %4411 = vmatprep.subr.bf16.mxu0 %v6408_v45 }
 0x327   :  { %4413 = vmatpush3.bf16.msra.mxu0 %v5495_v62 }
 0x328   :  { %4414 = vmatprep.subr.bf16.mxu0 %v6408_v45 }
 0x32b   :  { %4416 = vmatpush3.bf16.msra.mxu0 %v5507_v61 }
 0x32c   :  { %4417 = vmatprep.subr.bf16.mxu0 %v6408_v45 }
 0x32f   :  { %4419 = vmatpush3.bf16.msra.mxu0 %v5519_v59 }
 0x330   :  { %4420 = vmatprep.subr.bf16.mxu0 %v6408_v45 }
 0x333   :  { %4422 = vmatpush3.bf16.msra.mxu0 %v5532_v21 }
 0x334   :  { %4423 = vmatprep.subr.bf16.mxu0 %v6408_v45 }
 0x337   :  { %4425 = vmatpush3.bf16.msra.mxu0 %v5547_v24 }
 0x338   :  { %4426 = vmatprep.subr.bf16.mxu0 %v6408_v45 }
 0x33b   :  { %4428 = vmatpush3.bf16.msra.mxu0 %v5561_v42 }
 0x33c   :  { %4454 = vmatprep.subr.bf16.mxu0 %v4876_v8 }
 0x33e   :  { %3717 = vmatmul.mubr.f32.vlgmr.msra.gmra.mrb[18].mxu0 %v1406_v32 }
 0x33f   :  { %4456 = vmatpush1.bf16.msra.mxu0 %v6437_v26  ;;  %1776 = vmatprep.mubr.f32.mxu0 %v6411_v33 }
 0x340   :  { %4458 = vmatprep.subr.bf16.mxu0 %v6438_v31 }
 0x343   :  { %4460 = vmatpush1.bf16.msra.mxu0 %v6439_v44 }
 0x344   :  { %4462 = vmatprep.subr.bf16.mxu0 %v6440_v57 }
 0x347   :  { %4464 = vmatpush1.bf16.msra.mxu0 %v6441_v46  ;;  %v6483_v46 = vld [vmem:[#allocation52_spill] sm:$0xff] }
 0x348   :  { %4466 = vmatprep.subr.bf16.mxu0 %v6442_v0 }
 0x34b   :  { %4468 = vmatpush1.bf16.msra.mxu0 %v6443_v6 }
 0x34c   :  { %4470 = vmatprep.subr.bf16.mxu0 %v6444_v15 }
 0x34f   :  { %4472 = vmatpush1.bf16.msra.mxu0 %v6445_v23 }
 0x350   :  { %4474 = vmatprep.subr.bf16.mxu0 %v6446_v14 }
 0x353   :  { %4476 = vmatpush1.bf16.msra.mxu0 %v6447_v49 }
 0x354   :  { %4496 = vmatprep.subr.bf16.mxu0 %v6448_v2 }
 0x356   :  { %2934 = vmatmul.mubr.msk.f32.vlgmr.msra.gmra.mrb[20].mxu0 %vm114_vm0, %v1638_v48 }
 0x357   :  { %4498 = vmatpush3.bf16.msra.mxu0 %v6449_v37  ;;  %v6482_v37 = vld [vmem:[#allocation49_spill] sm:$0xff] }
 0x358   :  { %4500 = vmatprep.subr.bf16.mxu0 %v6450_v13  ;;  %v6481_v13 = vld [vmem:[#allocation47_spill] sm:$0xff] }
 0x35b   :  { %4502 = vmatpush3.bf16.msra.mxu0 %v6451_v18  ;;  %v6480_v18 = vld [vmem:[#allocation45_spill] sm:$0xff] }
 0x35c   :  { %4504 = vmatprep.subr.bf16.mxu0 %v6452_v50  ;;  %v6479_v50 = vld [vmem:[#allocation44_spill] sm:$0xff] }
 0x35f   :  { %4506 = vmatpush3.bf16.msra.mxu0 %v6453_v38  ;;  %v6478_v38 = vld [vmem:[#allocation43_spill] sm:$0xff] }
 0x360   :  { %4508 = vmatprep.subr.bf16.mxu0 %v6454_v28  ;;  %v6476_v28 = vld [vmem:[#allocation41_spill] sm:$0xff] }
 0x363   :  { %4510 = vmatpush3.bf16.msra.mxu0 %v6455_v19  ;;  %v6475_v19 = vld [vmem:[#allocation40_spill] sm:$0xff] }
 0x364   :  { %4512 = vmatprep.subr.bf16.mxu0 %v6456_v3  ;;  %v6474_v3 = vld [vmem:[#allocation39_spill] sm:$0xff] }
 0x367   :  { %4514 = vmatpush3.bf16.msra.mxu0 %v6457_v41 }
 0x368   :  { %4516 = vmatprep.subr.bf16.mxu0 %v6458_v1 }
 0x36b   :  { %4518 = vmatpush3.bf16.msra.mxu0 %v6459_v52 }
 0x36c   :  { %4520 = vmatprep.subr.bf16.mxu0 %v6460_v36 }
 0x36f   :  { %4522 = vmatpush3.bf16.msra.mxu0 %v6461_v7 }
 0x370   :  { %4524 = vmatprep.subr.bf16.mxu0 %v6462_v5  ;;  %v6473_v5 = vld [vmem:[#allocation38_spill] sm:$0xff] }
 0x373   :  { %4526 = vmatpush3.bf16.msra.mxu0 %v6463_v25  ;;  %v6472_v25 = vld [vmem:[#allocation37_spill] sm:$0xff] }
 0x374   :  { %4559 = vmatprep.subr.bf16.mxu0 %v6408_v45 }
 0x3b9   :  { %v5834_v54 = vpop.f32.mrb[12].mxu0 }
 0x3ba   :  { %6464 = vst [vmem:[#allocation13_spill] sm:$0xff] %v5834_v54  ;;  %v3656_v30 = vpop.f32.mrb[13].mxu0  ;;  %v6471_v54 = vld [vmem:[#allocation36_spill] sm:$0xff] }
 0x3bb   :  { %v6465_v30 = vld [vmem:[#allocation25_spill] sm:$0xff] }
 0x3d1   :  { %v1327_v55 = vpop.f32.mrb[14].mxu0 }
 0x3d2   :  { %v1328_v60 = vadd.f32 %v1327_v55, %v5453_v4  ;;  %v1329_v32 = vpop.f32.mrb[15].mxu0  ;;  %v6466_v55 = vld [vmem:[#allocation28_spill] sm:$0xff] }
 0x3d3   :  { %v1330_v1 = vadd.f32 %v1329_v32, %v5459_v16  ;;  %v6468_v32 = vld [vmem:[#allocation32_spill] sm:$0xff] }
 0x3d4   :  { %v1404_v41 = vmax.f32 %v1328_v60, 0.0  ;;  %v6467_v60 = vld [vmem:[#allocation29_spill] sm:$0xff] }
 0x3d5   :  { %v1405_v52 = vmax.f32 %v1330_v1, 0.0 }
 0x3d7   :  { %1541 = vmatprep.mubr.f32.mxu1 %v1405_v52 }
 0x3d8   :  { %1542 = vmatmul.mubr.f32.vlgmr.msra.gmra.mrb[16].mxu1 %v1404_v41 }
 0x3d9   :  { %4432 = vmatpush1.bf16.msra.mxu1 %v4878_v9  ;;  %1705 = vmatprep.mubr.f32.mxu1 %v6411_v33 }
 0x3da   :  { %4434 = vmatprep.subr.bf16.mxu1 %v4903_v17 }
 0x3dd   :  { %4436 = vmatpush1.bf16.msra.mxu1 %v4917_v22 }
 0x3de   :  { %4438 = vmatprep.subr.bf16.mxu1 %v4932_v27 }
 0x3e1   :  { %4440 = vmatpush1.bf16.msra.mxu1 %v4955_v35 }
 0x3e2   :  { %4442 = vmatprep.subr.bf16.mxu1 %v4970_v40 }
 0x3e5   :  { %4444 = vmatpush1.bf16.msra.mxu1 %v5003_v51 }
 0x3e6   :  { %4446 = vmatprep.subr.bf16.mxu1 %v5009_v53 }
 0x3e9   :  { %4448 = vmatpush1.bf16.msra.mxu1 %v5039_v63 }
 0x3ea   :  { %4450 = vmatprep.subr.bf16.mxu1 %v6435_v12 }
 0x3ed   :  { %4452 = vmatpush1.bf16.msra.mxu1 %v5063_v11 }
 0x3ee   :  { %4477 = vmatprep.subr.bf16.mxu1 %v6408_v45 }
 0x3f0   :  { %2933 = vmatmul.mubr.msk.f32.vlgmr.msra.gmra.mrb[18].mxu1 %vm114_vm0, %v1638_v48 }
 0x3f1   :  { %4479 = vmatpush3.bf16.msra.mxu1 %v5099_v29  ;;  %3743 = vmatprep.mubr.msk.f32.mxu1 %vm4816_vm1, %v6411_v33  ;;  %v3203_v1 = vpop.f32.mrb[16].mxu0 }
 0x3f2   :  { %4480 = vmatprep.subr.bf16.mxu1 %v6408_v45  ;;  %v3204_v41 = vpop.f32.mrb[17].mxu0 }
 0x3f3   :  { %v3205_v52 = vadd.f32 %v3204_v41, %v3203_v1  ;;  %v6469_v1 = vld [vmem:[#allocation33_spill] sm:$0xff]  ;;  %v6470_v41 = vld [vmem:[#allocation35_spill] sm:$0xff] }
 0x3f5   :  { %4482 = vmatpush3.bf16.msra.mxu1 %v5131_v43  ;;  %v1474_v57 = vadd.f32 %v3205_v52, %v6483_v46  ;;  %v6488_v52 = vld [vmem:[#allocation6_spill] sm:$0xff] }
 0x3f6   :  { %4483 = vmatprep.subr.bf16.mxu1 %v6408_v45 }
 0x3f9   :  { %4485 = vmatpush3.bf16.msra.mxu1 %v5161_v56 }
 0x3fa   :  { %4486 = vmatprep.subr.bf16.mxu1 %v6408_v45 }
 0x3fd   :  { %4488 = vmatpush3.bf16.msra.mxu1 %v5189_v10 }
 0x3fe   :  { %4489 = vmatprep.subr.bf16.mxu1 %v6408_v45 }
 0x401   :  { %4491 = vmatpush3.bf16.msra.mxu1 %v6465_v30 }
 0x402   :  { %4492 = vmatprep.subr.bf16.mxu1 %v6408_v45 }
 0x405   :  { %4494 = vmatpush3.bf16.msra.mxu1 %v6466_v55 }
 0x406   :  { %4528 = vmatprep.subr.bf16.mxu1 %v6467_v60 }
 0x408   :  { %3744 = vmatmul.mubr.msk.f32.vlgmr.msra.gmra.mrb[20].mxu1 %vm114_vm0, %v1638_v48  ;;  %v6477_v48 = vld [vmem:[#allocation42_spill] sm:$0xff] }
 0x409   :  { %4530 = vmatpush3.bf16.msra.mxu1 %v6468_v32 }
 0x40a   :  { %4532 = vmatprep.subr.bf16.mxu1 %v6469_v1 }
 0x40d   :  { %4534 = vmatpush3.bf16.msra.mxu1 %v6470_v41 }
 0x40e   :  { %4536 = vmatprep.subr.bf16.mxu1 %v6471_v54 }
 0x411   :  { %4538 = vmatpush3.bf16.msra.mxu1 %v6472_v25  ;;  %v1613_v7 = vpop.f32.mrb[18].mxu0 }
 0x412   :  { %4540 = vmatprep.subr.bf16.mxu1 %v6473_v5  ;;  %v3718_v36 = vpop.f32.mrb[19].mxu0 }
 0x415   :  { %4542 = vmatpush3.bf16.msra.mxu1 %v6474_v3 }
 0x416   :  { %4544 = vmatprep.subr.bf16.mxu1 %v6475_v19 }
 0x419   :  { %4546 = vmatpush3.bf16.msra.mxu1 %v6476_v28 }
 0x41a   :  { %4548 = vmatprep.subr.bf16.mxu1 %v6477_v48 }
 0x41d   :  { %4550 = vmatpush3.bf16.msra.mxu1 %v6478_v38 }
 0x41e   :  { %4552 = vmatprep.subr.bf16.mxu1 %v6479_v50 }
 0x421   :  { %4554 = vmatpush3.bf16.msra.mxu1 %v6480_v18 }
 0x422   :  { %4556 = vmatprep.subr.bf16.mxu1 %v6481_v13 }
 0x425   :  { %4558 = vmatpush3.bf16.msra.mxu1 %v6482_v37 }
 0x426   :  { %4583 = vmatprep.subr.bf16.mxu1 %v6408_v45 }
 0x429   :  { %v1778_v36 = vpop.f32.mrb[20].mxu0 }
 0x42a   :  { %v1779_v2 = vadd.f32 %v1778_v36, %v5453_v4  ;;  %v1780_v49 = vpop.f32.mrb[21].mxu0 }
 0x42b   :  { %v1781_v14 = vadd.f32 %v1780_v49, %v5459_v16 }
 0x42c   :  { %v1855_v23 = vmax.f32 %v1779_v2, 0.0 }
 0x42d   :  { %v1856_v15 = vmax.f32 %v1781_v14, 0.0 }
 0x42f   :  { %1992 = vmatprep.mubr.f32.mxu1 %v1856_v15 }
 0x430   :  { %1993 = vmatmul.mubr.f32.vlgmr.msra.gmra.mrb[22].mxu1 %v1855_v23 }
 0x431   :  { %3801 = vmatprep.mubr.msk.f32.mxu1 %vm4816_vm1, %v6411_v33 }
 0x4ab   :  { %v3238_v6 = vpop.f32.mrb[16].mxu1 }
 0x4ac   :  { %v3239_v0 = vpop.f32.mrb[17].mxu1 }
 0x4ad   :  { %v3240_v44 = vadd.f32 %v3239_v0, %v3238_v6 }
 0x4af   :  { %v1544_v31 = vadd.f32 %v3240_v44, %v1474_v57  ;;  %v6484_v44 = vld [vmem:[#allocation2_spill] sm:$0xff] }
 0x4b1   :  { %v5888_v26 = vadd.f32 %v1613_v7, %v1544_v31 }
 0x4c3   :  { %v1707_v8 = vpop.f32.mrb[18].mxu1 }
 0x4c4   :  { %v1708_v36 = vadd.f32 %v1707_v8, %v6432_v39  ;;  %v1709_v4 = vpop.f32.mrb[19].mxu1 }
 0x4c5   :  { %v1710_v49 = vadd.f32 %v1709_v4, %v5456_v34 }
 0x4c6   :  { %v1853_v15 = vmax.f32 %v1708_v36, 0.0 }
 0x4c7   :  { %v1854_v14 = vmax.f32 %v1710_v49, 0.0  ;;  %v6496_v49 = vld [vmem:[#allocation15_spill] sm:$0xff] }
 0x4c9   :  { %1922 = vmatprep.mubr.f32.mxu0 %v1854_v14 }
 0x4ca   :  { %1923 = vmatmul.mubr.f32.vlgmr.msra.gmra.mrb[22].mxu0 %v1853_v15  ;;  %v6497_v15 = vld [vmem:[#allocation16_spill] sm:$0xff] }
 0x4cb   :  { %4561 = vmatpush3.bf16.msra.mxu0 %v5471_v47  ;;  %3778 = vmatprep.mubr.msk.f32.mxu0 %vm4816_vm1, %v6411_v33 }
 0x4cc   :  { %4562 = vmatprep.subr.bf16.mxu0 %v6408_v45 }
 0x4cf   :  { %4564 = vmatpush3.bf16.msra.mxu0 %v5480_v20 }
 0x4d0   :  { %4565 = vmatprep.subr.bf16.mxu0 %v6408_v45 }
 0x4d3   :  { %4567 = vmatpush3.bf16.msra.mxu0 %v5495_v62 }
 0x4d4   :  { %4568 = vmatprep.subr.bf16.mxu0 %v6408_v45 }
 0x4d7   :  { %4570 = vmatpush3.bf16.msra.mxu0 %v5507_v61 }
 0x4d8   :  { %4571 = vmatprep.subr.bf16.mxu0 %v6408_v45 }
 0x4db   :  { %4573 = vmatpush3.bf16.msra.mxu0 %v5519_v59  ;;  %v1849_v4 = vpop.f32.mrb[20].mxu1 }
 0x4dc   :  { %v3745_v8 = vpop.f32.mrb[21].mxu1  ;;  %4574 = vmatprep.subr.bf16.mxu0 %v6408_v45  ;;  %v1850_v7 = vadd.f32 %v1849_v4, %v5544_v58 }
 0x4dd   :  { %v6498_v8 = vld [vmem:[#allocation17_spill] sm:$0xff] }
 0x4de   :  { %v1857_v31 = vmax.f32 %v1850_v7, 0.0  ;;  %v6499_v7 = vld [vmem:[#allocation18_spill] sm:$0xff] }
 0x4df   :  { %4576 = vmatpush3.bf16.msra.mxu0 %v5532_v21 }
 0x4e0   :  { %4577 = vmatprep.subr.bf16.mxu0 %v6408_v45 }
 0x4e3   :  { %4579 = vmatpush3.bf16.msra.mxu0 %v5547_v24 }
 0x4e4   :  { %4580 = vmatprep.subr.bf16.mxu0 %v6408_v45 }
 0x4e7   :  { %4582 = vmatpush3.bf16.msra.mxu0 %v5561_v42 }
 0x4e8   :  { %4599 = vmatprep.subr.bf16.mxu0 %v6484_v44  ;;  %v6501_v44 = vld [vmem:[#allocation20_spill] sm:$0xff] }
 0x4ea   :  { %3779 = vmatmul.mubr.f32.vlgmr.msra.gmra.mrb[24].mxu0 %v1857_v31  ;;  %v6500_v31 = vld [vmem:[#allocation19_spill] sm:$0xff] }
 0x4eb   :  { %4601 = vmatpush1.bf16.msra.mxu0 %v4878_v9  ;;  %2220 = vmatprep.mubr.f32.mxu0 %v6411_v33  ;;  %v5926_v9 = vld [vmem:[%s6216_s0 + $0x6] sm:$0x3] }
 0x4ec   :  { %4603 = vmatprep.subr.bf16.mxu0 %v4903_v17 }
 0x4ef   :  { %4605 = vmatpush1.bf16.msra.mxu0 %v4917_v22 }
 0x4f0   :  { %4607 = vmatprep.subr.bf16.mxu0 %v4932_v27 }
 0x4f3   :  { %4609 = vmatpush1.bf16.msra.mxu0 %v4955_v35  ;;  %v2069_v35 = vld [vmem:[%s6218_s3 + $0xf0] sm:$0xff] }
 0x4f4   :  { %4611 = vmatprep.subr.bf16.mxu0 %v4970_v40  ;;  %v2070_v40 = vld [vmem:[%s6218_s3 + $0xf8] sm:$0xff] }
 0x4f7   :  { %4613 = vmatpush1.bf16.msra.mxu0 %v5003_v51  ;;  %v2071_v51 = vld [vmem:[%s6218_s3 + $0x100] sm:$0xff] }
 0x4f8   :  { %4615 = vmatprep.subr.bf16.mxu0 %v5009_v53  ;;  %v4584_v53 = vpack.c.bf16 %v2070_v40, %v2069_v35  ;;  %v6506_v35 = vld [vmem:[#allocation26_spill] sm:$0xff] }
 0x4fa   :  { %4585 = vmatpush3.bf16.msra.mxu1 %v4584_v53  ;;  %v6508_v53 = vld [vmem:[#allocation30_spill] sm:$0xff] }
 0x4fb   :  { %4617 = vmatpush1.bf16.msra.mxu0 %v5039_v63  ;;  %v2072_v63 = vld [vmem:[%s6218_s3 + $0x108] sm:$0xff]  ;;  %4586 = vmatprep.subr.bf16.mxu1 %v6408_v45 }
 0x4fc   :  { %4619 = vmatprep.subr.bf16.mxu0 %v6435_v12 }
 0x4ff   :  { %4621 = vmatpush1.bf16.msra.mxu0 %v5063_v11  ;;  %v4587_v11 = vpack.c.bf16 %v2072_v63, %v2071_v51  ;;  %v6509_v63 = vld [vmem:[#allocation31_spill] sm:$0xff] }
 0x500   :  { %4646 = vmatprep.subr.bf16.mxu0 %v6408_v45 }
 0x501   :  { %4588 = vmatpush3.bf16.msra.mxu1 %v4587_v11 }
 0x502   :  { %2937 = vmatmul.mubr.msk.f32.vlgmr.msra.gmra.mrb[26].mxu0 %vm114_vm0, %v5926_v9  ;;  %4589 = vmatprep.subr.bf16.mxu1 %v6408_v45 }
 0x503   :  { %4648 = vmatpush3.bf16.msra.mxu0 %v5099_v29  ;;  %3828 = vmatprep.mubr.msk.f32.mxu0 %vm4816_vm1, %v6411_v33  ;;  %v3338_v17 = vpop.f32.mrb[22].mxu1  ;;  %v2073_v29 = vld [vmem:[%s6218_s3 + $0x110] sm:$0xff] }
 0x504   :  { %4649 = vmatprep.subr.bf16.mxu0 %v6408_v45  ;;  %v3339_v22 = vpop.f32.mrb[23].mxu1 }
 0x505   :  { %v3340_v27 = vadd.f32 %v3339_v22, %v3338_v17  ;;  %v6502_v17 = vld [vmem:[#allocation21_spill] sm:$0xff]  ;;  %v6503_v22 = vld [vmem:[#allocation22_spill] sm:$0xff] }
 0x507   :  { %4651 = vmatpush3.bf16.msra.mxu0 %v5131_v43  ;;  %v2074_v43 = vld [vmem:[%s6218_s3 + $0x118] sm:$0xff] }
 0x508   :  { %4652 = vmatprep.subr.bf16.mxu0 %v6408_v45 }
 0x50b   :  { %4654 = vmatpush3.bf16.msra.mxu0 %v5161_v56  ;;  %v4590_v56 = vpack.c.bf16 %v2074_v43, %v2073_v29  ;;  %v6510_v29 = vld [vmem:[#allocation34_spill] sm:$0xff] }
 0x50c   :  { %4655 = vmatprep.subr.bf16.mxu0 %v6408_v45  ;;  %v6511_v43 = vld [vmem:[#allocation46_spill] sm:$0xff] }
 0x50d   :  { %4591 = vmatpush3.bf16.msra.mxu1 %v4590_v56 }
 0x50e   :  { %4592 = vmatprep.subr.bf16.mxu1 %v6408_v45 }
 0x50f   :  { %4657 = vmatpush3.bf16.msra.mxu0 %v5189_v10  ;;  %v2075_v10 = vld [vmem:[%s6218_s3 + $0x120] sm:$0xff] }
 0x510   :  { %4658 = vmatprep.subr.bf16.mxu0 %v6408_v45 }
 0x513   :  { %4660 = vmatpush3.bf16.msra.mxu0 %v6465_v30  ;;  %v6489_v30 = vld [vmem:[#allocation7_spill] sm:$0xff] }
 0x514   :  { %4661 = vmatprep.subr.bf16.mxu0 %v6408_v45 }
 0x517   :  { %4663 = vmatpush3.bf16.msra.mxu0 %v6466_v55  ;;  %v6490_v55 = vld [vmem:[#allocation8_spill] sm:$0xff] }
 0x518   :  { %4697 = vmatprep.subr.bf16.mxu0 %v6467_v60  ;;  %v6492_v60 = vld [vmem:[#allocation10_spill] sm:$0xff] }
 0x51a   :  { %3829 = vmatmul.mubr.msk.f32.vlgmr.msra.gmra.mrb[28].mxu0 %vm114_vm0, %v5926_v9 }
 0x51b   :  { %4699 = vmatpush3.bf16.msra.mxu0 %v6468_v32  ;;  %v6493_v32 = vld [vmem:[#allocation11_spill] sm:$0xff] }
 0x51c   :  { %4701 = vmatprep.subr.bf16.mxu0 %v6469_v1  ;;  %v6494_v1 = vld [vmem:[#allocation12_spill] sm:$0xff] }
 0x51f   :  { %4703 = vmatpush3.bf16.msra.mxu0 %v6470_v41  ;;  %v6495_v41 = vld [vmem:[#allocation14_spill] sm:$0xff] }
 0x520   :  { %4705 = vmatprep.subr.bf16.mxu0 %v6471_v54  ;;  %v6487_v54 = vld [vmem:[#allocation5_spill] sm:$0xff] }
 0x523   :  { %4707 = vmatpush3.bf16.msra.mxu0 %v6472_v25  ;;  %v2076_v25 = vld [vmem:[%s6218_s3 + $0x128] sm:$0xff] }
 0x524   :  { %4709 = vmatprep.subr.bf16.mxu0 %v6473_v5  ;;  %v4593_v5 = vpack.c.bf16 %v2076_v25, %v2075_v10  ;;  %v6512_v10 = vld [vmem:[#allocation48_spill] sm:$0xff] }
 0x526   :  { %4594 = vmatpush3.bf16.msra.mxu1 %v4593_v5  ;;  %v638_v5 = vld [vmem:[%s6218_s3 + $0x30] sm:$0xff] }
 0x527   :  { %4711 = vmatpush3.bf16.msra.mxu0 %v6474_v3  ;;  %4595 = vmatprep.subr.bf16.mxu1 %v6408_v45  ;;  %v2077_v3 = vld [vmem:[%s6218_s3 + $0x130] sm:$0xff] }
 0x528   :  { %4713 = vmatprep.subr.bf16.mxu0 %v6475_v19 }
 0x52b   :  { %4715 = vmatpush3.bf16.msra.mxu0 %v6476_v28 }
 0x52c   :  { %4717 = vmatprep.subr.bf16.mxu0 %v6477_v48 }
 0x52f   :  { %4719 = vmatpush3.bf16.msra.mxu0 %v6478_v38  ;;  %v2078_v38 = vld [vmem:[%s6218_s3 + $0x138] sm:$0xff] }
 0x530   :  { %4721 = vmatprep.subr.bf16.mxu0 %v6479_v50  ;;  %v4596_v19 = vpack.c.bf16 %v2078_v38, %v2077_v3  ;;  %v6485_v50 = vld [vmem:[#allocation3_spill] sm:$0xff] }
 0x531   :  { %v639_v3 = vld [vmem:[%s6218_s3 + $0x38] sm:$0xff] }
 0x532   :  { %4597 = vmatpush3.bf16.msra.mxu1 %v4596_v19  ;;  %v4777_v38 = vpack.c.bf16 %v639_v3, %v638_v5  ;;  %v640_v19 = vld [vmem:[%s6218_s3 + $0x40] sm:$0xff]  ;;  %v1627_v3 = vld [vmem:[%s6218_s3 + $0xe8] sm:$0xff] }
 0x533   :  { %4723 = vmatpush3.bf16.msra.mxu0 %v6480_v18  ;;  %4623 = vmatprep.subr.bf16.mxu1 %v6485_v50  ;;  %v6486_v18 = vld [vmem:[#allocation4_spill] sm:$0xff]  ;;  %v641_v50 = vld [vmem:[%s6218_s3 + $0x48] sm:$0xff] }
 0x534   :  { %4725 = vmatprep.subr.bf16.mxu0 %v6481_v13  ;;  %v1626_v5 = vld [vmem:[%s6218_s3 + $0xe0] sm:$0xff] }
 0x537   :  { %4727 = vmatpush3.bf16.msra.mxu0 %v6482_v37 }
 0x538   :  { %4752 = vmatprep.subr.bf16.mxu0 %v6408_v45 }
 0x59d   :  { %v3303_v28 = vpop.f32.mrb[22].mxu0 }
 0x59e   :  { %v3304_v12 = vpop.f32.mrb[23].mxu0 }
 0x59f   :  { %v3305_v57 = vadd.f32 %v3304_v12, %v3303_v28  ;;  %v4780_v28 = vpack.c.bf16 %v641_v50, %v640_v19  ;;  %v6513_v12 = vld [vmem:[#allocation50_spill] sm:$0xff]  ;;  %v1617_v19 = vmax.f32 %v5888_v26, 0.0  ;;  %v2823_v50 = vld [vmem:[%s6219_s4] sm:$0xff]  ;;  %v2826_v26 = vld [vmem:[%s6219_s4 + $0x18] sm:$0xff] }
 0x5a1   :  { %v1925_v0 = vadd.f32 %v3305_v57, %v6483_v46  ;;  %v6491_v46 = vld [vmem:[#allocation9_spill] sm:$0xff]  ;;  %v631_v57 = vmax.f32 %v6513_v12, 0.0 }
 0x5a3   :  { %v1995_v6 = vadd.f32 %v3340_v27, %v1925_v0  ;;  %v6505_v27 = vld [vmem:[#allocation24_spill] sm:$0xff] }
 0x5bd   :  { %v2064_v23 = vpop.f32.mrb[24].mxu0 }
 0x5be   :  { %v2065_v2 = vadd.f32 %v2064_v23, %v1995_v6  ;;  %v3780_v37 = vpop.f32.mrb[25].mxu0 }
 0x5c0   :  { %v2068_v13 = vmax.f32 %v2065_v2, 0.0  ;;  %v6514_v2 = vld [vmem:[#allocation51_spill] sm:$0xff] }
 0x5c2   :  { %3802 = vmatmul.mubr.msk.f32.vlgmr.msra.gmra.mrb[24].mxu1 %vm1098_vm4, %v2068_v13 }
 0x5c3   :  { %4625 = vmatpush1.bf16.msra.mxu1 %v6486_v18  ;;  %2291 = vmatprep.mubr.f32.mxu1 %v6411_v33  ;;  %v2584_v18 = vld [vmem:[%s6218_s3 + $0x140] sm:$0xff] }
 0x5c4   :  { %4627 = vmatprep.subr.bf16.mxu1 %v6487_v54  ;;  %v2585_v54 = vld [vmem:[%s6218_s3 + $0x148] sm:$0xff] }
 0x5c7   :  { %4629 = vmatpush1.bf16.msra.mxu1 %v6488_v52 }
 0x5c8   :  { %4631 = vmatprep.subr.bf16.mxu1 %v6489_v30 }
 0x5cb   :  { %4633 = vmatpush1.bf16.msra.mxu1 %v6490_v55  ;;  %v4753_v55 = vpack.c.bf16 %v2585_v54, %v2584_v18 }
 0x5cc   :  { %4635 = vmatprep.subr.bf16.mxu1 %v6491_v46 }
 0x5cf   :  { %4637 = vmatpush1.bf16.msra.mxu1 %v6492_v60  ;;  %v2586_v60 = vld [vmem:[%s6218_s3 + $0x150] sm:$0xff] }
 0x5d0   :  { %4639 = vmatprep.subr.bf16.mxu1 %v6493_v32  ;;  %v2587_v32 = vld [vmem:[%s6218_s3 + $0x158] sm:$0xff] }
 0x5d3   :  { %4641 = vmatpush1.bf16.msra.mxu1 %v6494_v1  ;;  %v4756_v1 = vpack.c.bf16 %v2587_v32, %v2586_v60 }
 0x5d4   :  { %4643 = vmatprep.subr.bf16.mxu1 %v6495_v41  ;;  %v2589_v41 = vld [vmem:[%s6218_s3 + $0x168] sm:$0xff] }
 0x5d5   :  { %v2222_v48 = vpop.f32.mrb[26].mxu0 }
 0x5d6   :  { %v2224_v36 = vpop.f32.mrb[27].mxu0  ;;  %v2223_v11 = vadd.f32 %v2222_v48, %v6432_v39 }
 0x5d7   :  { %4645 = vmatpush1.bf16.msra.mxu1 %v6496_v49  ;;  %v2225_v14 = vadd.f32 %v2224_v36, %v5456_v34  ;;  %v6504_v34 = vld [vmem:[#allocation23_spill] sm:$0xff] }
 0x5d8   :  { %4665 = vmatprep.subr.bf16.mxu1 %v6497_v15  ;;  %v2368_v56 = vmax.f32 %v2223_v11, 0.0 }
 0x5d9   :  { %v2369_v4 = vmax.f32 %v2225_v14, 0.0 }
 0x5da   :  { %2938 = vmatmul.mubr.msk.f32.vlgmr.msra.gmra.mrb[26].mxu1 %vm114_vm0, %v5926_v9  ;;  %v6507_v9 = vld [vmem:[#allocation27_spill] sm:$0xff] }
 0x5db   :  { %4667 = vmatpush3.bf16.msra.mxu1 %v6498_v8  ;;  %2437 = vmatprep.mubr.f32.mxu1 %v2369_v4 }
 0x5dc   :  { %4669 = vmatprep.subr.bf16.mxu1 %v6499_v7  ;;  %v6515_v7 = vld [vmem:[#allocation13_spill] sm:$0xff] }
 0x5df   :  { %4671 = vmatpush3.bf16.msra.mxu1 %v6500_v31 }
 0x5e0   :  { %4673 = vmatprep.subr.bf16.mxu1 %v6501_v44 }
 0x5e3   :  { %4675 = vmatpush3.bf16.msra.mxu1 %v6502_v17  ;;  %v2590_v17 = vld [vmem:[%s6218_s3 + $0x170] sm:$0xff] }
 0x5e4   :  { %4677 = vmatprep.subr.bf16.mxu1 %v6503_v22  ;;  %v2591_v22 = vld [vmem:[%s6218_s3 + $0x178] sm:$0xff] }
 0x5e7   :  { %4679 = vmatpush3.bf16.msra.mxu1 %v6504_v34  ;;  %v4762_v34 = vpack.c.bf16 %v2591_v22, %v2590_v17 }
 0x5e8   :  { %4681 = vmatprep.subr.bf16.mxu1 %v6505_v27  ;;  %v2592_v27 = vld [vmem:[%s6218_s3 + $0x180] sm:$0xff] }
 0x5eb   :  { %4683 = vmatpush3.bf16.msra.mxu1 %v6506_v35  ;;  %v2593_v35 = vld [vmem:[%s6218_s3 + $0x188] sm:$0xff] }
 0x5ec   :  { %4685 = vmatprep.subr.bf16.mxu1 %v6507_v9  ;;  %v4765_v9 = vpack.c.bf16 %v2593_v35, %v2592_v27 }
 0x5ed   :  { %v2364_v40 = vpop.f32.mrb[28].mxu0 }
 0x5ee   :  { %v3830_v51 = vpop.f32.mrb[29].mxu0  ;;  %v2365_v39 = vadd.f32 %v2364_v40, %v5544_v58 }
 0x5ef   :  { %4687 = vmatpush3.bf16.msra.mxu1 %v6508_v53  ;;  %v4812_v53 = vld [vmem:[%s6217_s5 + $0x5] ss:$0 sm:$0xff] }
 0x5f0   :  { %4689 = vmatprep.subr.bf16.mxu1 %v6509_v63 }
 0x5f3   :  { %4691 = vmatpush3.bf16.msra.mxu1 %v6510_v29 }
 0x5f4   :  { %4693 = vmatprep.subr.bf16.mxu1 %v6511_v43  ;;  %v1618_v43 = vld [vmem:[%s6218_s3 + $0xa0] sm:$0xff] }
 0x5f7   :  { %4695 = vmatpush3.bf16.msra.mxu1 %v6512_v10 }
 0x5f8   :  { %4728 = vmatprep.subr.bf16.mxu1 %v6408_v45 }
 0x5fa   :  { %2438 = vmatmul.mubr.f32.vlgmr.msra.gmra.mrb[28].mxu1 %v2368_v56  ;;  %v1619_v56 = vld [vmem:[%s6218_s3 + $0xa8] sm:$0xff] }
 0x5fb   :  { %4730 = vmatpush3.bf16.msra.mxu1 %v5471_v47  ;;  %3863 = vmatprep.mubr.msk.f32.mxu1 %vm4816_vm1, %v6411_v33  ;;  %v632_v47 = vld [vmem:[%s6218_s3] sm:$0xff] }
 0x5fc   :  { %4731 = vmatprep.subr.bf16.mxu1 %v6408_v45 }
 0x5ff   :  { %4733 = vmatpush3.bf16.msra.mxu1 %v5480_v20  ;;  %v633_v20 = vld [vmem:[%s6218_s3 + $0x8] sm:$0xff] }
 0x600   :  { %4734 = vmatprep.subr.bf16.mxu1 %v6408_v45 }
 0x603   :  { %4736 = vmatpush3.bf16.msra.mxu1 %v5495_v62  ;;  %v2372_v62 = vmax.f32 %v2365_v39, 0.0  ;;  %v4783_v39 = vpack.c.bf16 %v1619_v56, %v1618_v43 }
 0x604   :  { %4737 = vmatprep.subr.bf16.mxu1 %v6408_v45 }
 0x607   :  { %4739 = vmatpush3.bf16.msra.mxu1 %v5507_v61  ;;  %v4768_v61 = vpack.c.bf16 %v633_v20, %v632_v47  ;;  %v1620_v20 = vld [vmem:[%s6218_s3 + $0xb0] sm:$0xff] }
 0x608   :  { %4740 = vmatprep.subr.bf16.mxu1 %v6408_v45 }
 0x60b   :  { %4742 = vmatpush3.bf16.msra.mxu1 %v5519_v59  ;;  %v634_v59 = vld [vmem:[%s6218_s3 + $0x10] sm:$0xff] }
 0x60c   :  { %4743 = vmatprep.subr.bf16.mxu1 %v6408_v45 }
 0x60f   :  { %4745 = vmatpush3.bf16.msra.mxu1 %v5532_v21  ;;  %v635_v21 = vld [vmem:[%s6218_s3 + $0x18] sm:$0xff] }
 0x610   :  { %4746 = vmatprep.subr.bf16.mxu1 %v6408_v45  ;;  %v4771_v58 = vpack.c.bf16 %v635_v21, %v634_v59  ;;  %v1622_v59 = vld [vmem:[%s6218_s3 + $0xc0] sm:$0xff]  ;;  %v1623_v21 = vld [vmem:[%s6218_s3 + $0xc8] sm:$0xff] }
 0x613   :  { %4748 = vmatpush3.bf16.msra.mxu1 %v5547_v24  ;;  %v636_v24 = vld [vmem:[%s6218_s3 + $0x20] sm:$0xff] }
 0x614   :  { %4749 = vmatprep.subr.bf16.mxu1 %v6408_v45 }
 0x617   :  { %4751 = vmatpush3.bf16.msra.mxu1 %v5561_v42  ;;  %v637_v42 = vld [vmem:[%s6218_s3 + $0x28] sm:$0xff] }
 0x618   :  { %4767 = vmatprep.subr.bf16.mxu1 %v6408_v45  ;;  %v4774_v25 = vpack.c.bf16 %v637_v42, %v636_v24  ;;  %v1624_v24 = vld [vmem:[%s6218_s3 + $0xd0] sm:$0xff]  ;;  %v1625_v42 = vld [vmem:[%s6218_s3 + $0xd8] sm:$0xff] }
 0x61a   :  { %3864 = vmatmul.mubr.f32.vlgmr.msra.gmra.mrb[30].mxu1 %v2372_v62  ;;  %v1621_v62 = vld [vmem:[%s6218_s3 + $0xb8] sm:$0xff] }
 0x61b   :  { %4769 = vmatpush3.bf16.msra.mxu1 %v4768_v61  ;;  %3909 = vmatprep.mubr.msk.f32.mxu1 %vm4816_vm1, %v6411_v33  ;;  %v4786_v61 = vpack.c.bf16 %v1621_v62, %v1620_v20 }
 0x61c   :  { %4770 = vmatprep.subr.bf16.mxu1 %v6408_v45 }
 0x61f   :  { %4772 = vmatpush3.bf16.msra.mxu1 %v4771_v58  ;;  %v4789_v58 = vpack.c.bf16 %v1623_v21, %v1622_v59 }
 0x620   :  { %4773 = vmatprep.subr.bf16.mxu1 %v6408_v45 }
 0x623   :  { %4775 = vmatpush3.bf16.msra.mxu1 %v4774_v25  ;;  %v4792_v25 = vpack.c.bf16 %v1625_v42, %v1624_v24 }
 0x624   :  { %4776 = vmatprep.subr.bf16.mxu1 %v6408_v45 }
 0x627   :  { %4778 = vmatpush3.bf16.msra.mxu1 %v4777_v38  ;;  %v4795_v38 = vpack.c.bf16 %v1627_v3, %v1626_v5 }
 0x628   :  { %4779 = vmatprep.subr.bf16.mxu1 %v6408_v45 }
 0x62b   :  { %4781 = vmatpush3.bf16.msra.mxu1 %v4780_v28  ;;  %v2824_v28 = vld [vmem:[%s6219_s4 + $0x8] sm:$0xff] }
 0x62c   :  { %4797 = vmatprep.subr.bf16.mxu1 %v6408_v45  ;;  %v4798_v12 = vpack.c.bf16 %v2824_v28, %v2823_v50 }
 0x62e   :  { %3910 = vmatmul.mubr.msk.f32.vlgmr.msra.gmra.mrb[32].mxu1 %vm1098_vm4, %v631_v57  ;;  %v2825_v57 = vld [vmem:[%s6219_s4 + $0x10] sm:$0xff] }
 0x62f   :  { %3949 = vmatprep.mubr.msk.f32.mxu1 %vm4816_vm1, %v6411_v33  ;;  %4799 = vmatpush3.bf16.msra.mxu1 %v4798_v12 }
 0x630   :  { %4800 = vmatprep.subr.bf16.mxu1 %v6408_v45 }
 0x695   :  { %v6093_v0 = vpop.f32.mrb[24].mxu1 }
 0x696   :  { %v3803_v6 = vpop.f32.mrb[25].mxu1 }
 0x697   :  { %v4801_v6 = vpack.c.bf16 %v2826_v26, %v2825_v57 }
 0x699   :  { %4802 = vmatpush3.bf16.msra.mxu1 %v4801_v6 }
 0x69a   :  { %4803 = vmatprep.subr.bf16.mxu1 %v6408_v45 }
 0x6ad   :  { %v2293_v23 = vpop.f32.mrb[26].mxu1 }
 0x6ae   :  { %v2294_v37 = vadd.f32 %v2293_v23, %v6514_v2  ;;  %v2295_v13 = vpop.f32.mrb[27].mxu1  ;;  %v2827_v23 = vld [vmem:[%s6219_s4 + $0x20] sm:$0xff]  ;;  %v2828_v2 = vld [vmem:[%s6219_s4 + $0x28] sm:$0xff] }
 0x6af   :  { %v2296_v52 = vadd.f32 %v2295_v13, %v5459_v16  ;;  %v2588_v16 = vld [vmem:[%s6218_s3 + $0x160] sm:$0xff]  ;;  %v2829_v13 = vld [vmem:[%s6219_s4 + $0x30] sm:$0x3] }
 0x6b0   :  { %v2370_v46 = vmax.f32 %v2294_v37, 0.0  ;;  %v4759_v48 = vpack.c.bf16 %v2589_v41, %v2588_v16  ;;  %v4804_v37 = vpack.c.bf16 %v2828_v2, %v2827_v23 }
 0x6b1   :  { %v2371_v30 = vmax.f32 %v2296_v52, 0.0 }
 0x6b2   :  { %4805 = vmatpush3.bf16.msra.mxu1 %v4804_v37 }
 0x6b3   :  { %2507 = vmatprep.mubr.f32.mxu0 %v2371_v30  ;;  %3947 = vmatprep.subr.mxu1 %v6411_v33 }
 0x6b4   :  { %2508 = vmatmul.mubr.f32.vlgmr.msra.gmra.mrb[30].mxu0 %v2370_v46  ;;  %v2943_v46 = vld [vmem:[%s6217_s5 + $0x6] ss:$0 sm:$0xff] }
 0x6b5   :  { %4754 = vmatpush3.bf16.msra.mxu0 %v4753_v55  ;;  %3886 = vmatprep.mubr.msk.f32.mxu0 %vm4816_vm1, %v6411_v33 }
 0x6b6   :  { %4755 = vmatprep.subr.bf16.mxu0 %v6408_v45  ;;  %3948 = vmatpush3.msk.msra.mxu1 %vm2840_vm5, %v2829_v13 }
 0x6b9   :  { %4757 = vmatpush3.bf16.msra.mxu0 %v4756_v1  ;;  %v2944_v1 = vld [vmem:[%s6217_s5 + $0x7] ss:$0 sm:$0xff] }
 0x6ba   :  { %4758 = vmatprep.subr.bf16.mxu0 %v6408_v45 }
 0x6bd   :  { %4760 = vmatpush3.bf16.msra.mxu0 %v4759_v48 }
 0x6be   :  { %4761 = vmatprep.subr.bf16.mxu0 %v6408_v45 }
 0x6c1   :  { %4763 = vmatpush3.bf16.msra.mxu0 %v4762_v34 }
 0x6c2   :  { %4764 = vmatprep.subr.bf16.mxu0 %v6408_v45 }
 0x6c5   :  { %4766 = vmatpush3.bf16.msra.mxu0 %v4765_v9 }
 0x6c6   :  { %4782 = vmatprep.subr.bf16.mxu0 %v6408_v45 }
 0x6cd   :  { %v3414_v36 = vpop.f32.mrb[28].mxu1 }
 0x6ce   :  { %v3415_v49 = vpop.f32.mrb[29].mxu1 }
 0x6cf   :  { %v3416_v14 = vadd.f32 %v3415_v49, %v3414_v36 }
 0x6d1   :  { %v2440_v63 = vadd.f32 %v4812_v53, %v3416_v14 }
 0x6ed   :  { %v2579_v15 = vpop.f32.mrb[30].mxu1 }
 0x6ee   :  { %v3865_v4 = vpop.f32.mrb[31].mxu1 }
 0x701   :  { %v2736_v8 = vpop.f32.mrb[32].mxu1 }
 0x702   :  { %v6121_v31 = vadd.f32 %v2736_v8, %v6515_v7  ;;  %v3911_v44 = vpop.f32.mrb[33].mxu1 }
 0x787   :  { %v3449_v40 = vpop.f32.mrb[30].mxu0 }
 0x788   :  { %v3450_v51 = vpop.f32.mrb[31].mxu0 }
 0x789   :  { %v3451_v11 = vadd.f32 %v3450_v51, %v3449_v40 }
 0x78b   :  { %v2510_v29 = vadd.f32 %v3451_v11, %v2440_v63 }
 0x78d   :  { %v2580_v10 = vadd.f32 %v2579_v15, %v2510_v29 }
 0x78f   :  { %v2583_v47 = vmax.f32 %v2580_v10, 0.0 }
 0x791   :  { %3887 = vmatmul.mubr.msk.f32.vlgmr.msra.gmra.mrb[32].mxu0 %vm1098_vm4, %v2583_v47 }
 0x792   :  { %4784 = vmatpush3.bf16.msra.mxu0 %v4783_v39  ;;  %3932 = vmatprep.mubr.msk.f32.mxu0 %vm4816_vm1, %v6411_v33 }
 0x793   :  { %4785 = vmatprep.subr.bf16.mxu0 %v6408_v45 }
 0x796   :  { %4787 = vmatpush3.bf16.msra.mxu0 %v4786_v61 }
 0x797   :  { %4788 = vmatprep.subr.bf16.mxu0 %v6408_v45 }
 0x79a   :  { %4790 = vmatpush3.bf16.msra.mxu0 %v4789_v58 }
 0x79b   :  { %4791 = vmatprep.subr.bf16.mxu0 %v6408_v45 }
 0x79e   :  { %4793 = vmatpush3.bf16.msra.mxu0 %v4792_v25 }
 0x79f   :  { %4794 = vmatprep.subr.bf16.mxu0 %v6408_v45 }
 0x7a2   :  { %4796 = vmatpush3.bf16.msra.mxu0 %v4795_v38 }
 0x7a5   :  { %3933 = vmatmul.mubr.msk.f32.vlgmr.msra.gmra.mrb[34].mxu0 %vm1098_vm4, %v1617_v19 }
 0x864   :  { %v2663_v18 = vpop.f32.mrb[32].mxu0 }
 0x865   :  { %v3888_v45 = vpop.f32.mrb[33].mxu0 }
 0x878   :  { %v2809_v54 = vpop.f32.mrb[34].mxu0 }
 0x879   :  { %v2810_v52 = vadd.f32 %v2809_v54, %v6093_v0  ;;  %v3934_v30 = vpop.f32.mrb[35].mxu0 }
 0x87b   :  { %v2813_v55 = vadd.f32 %v2810_v52, %v6121_v31 }
 0x87d   :  { %v2814_v60 = vadd.f32 %v2813_v55, %v2663_v18 }
 0x87f   :  { %v2821_v33 = vadd.f32 %v2943_v46, %v2814_v60 }
 0x881   :  { %v2822_v32 = vmax.f32 %v2821_v33, 0.0 }
 0x883   :  { %3950 = vmatmul.mubr.msk.f32.vlgmr.msra.gmra.mrb[34].mxu1 %vm2836_vm6, %v2822_v32 }
 0x956   :  { %v2910_v16 = vpop.f32.mrb[34].mxu1 }
 0x957   :  { %v2911_v41 = vadd.f32 %v2944_v1, %v2910_v16  ;;  %v3951_v48 = vpop.f32.mrb[35].mxu1 }
 0x959   :  { %2914 = vst [vmem:[%s6220_s6] sm:$0x3] %v2911_v41 }

</bundles_post_ra>
